<compile_context>
chip_gen: v7x
topology: tpu7x:2x2x1
jax: 0.10.0
libtpu: 0.0.40
codegen_flags: <defaults>
</compile_context>

<pallas_src>
import jax
import jax.numpy as jnp
import numpy as np
from jax.experimental import pallas as pl
from jax.experimental.pallas import tpu as pltpu

# ---------------- problem sizes (loss1 head of GoogLeNet/PoseNet) ----------------
N = 2          # batch
C_IN = 512     # conv in_channels
C_OUT = 128    # conv out_channels
H = W = 14     # input spatial (pool 5/3 -> 4x4 -> 128*16 = 2048 flat features)
PH = PW = (H - 5) // 3 + 1   # 4
P = PH * PW                  # 16
FLAT = C_OUT * P             # 2048
HID = 1024                   # fc out_features
HEADS = 8                    # 3 (xyz) + 4 (wpqr) + 1 zero pad

K_CHUNKS = 4                 # grid steps over the FC weight (pipelines its DMA)
PPC = P // K_CHUNKS          # pooled positions per chunk = 4
CH = PPC * C_OUT             # FC contraction width per chunk = 512


def _build_pool_matrix():
    """(H*W, P) matrix implementing AvgPool2d(kernel_size=5, stride=3)."""
    m = np.zeros((H * W, P), dtype=np.float32)
    for ph in range(PH):
        for pw in range(PW):
            for dh in range(5):
                for dw in range(5):
                    h = 3 * ph + dh
                    w = 3 * pw + dw
                    m[h * W + w, ph * PW + pw] = 1.0 / 25.0
    return m


# ---------------------------------- kernel ----------------------------------
def loss_header_kernel(x_ref, pool_ref, wconv_ref, bconv_ref,
                       w3_ref, bfc_ref, whead_ref, bhead_ref,
                       out_ref, h_sc):
    k = pl.program_id(0)
    n = x_ref.shape[0]
    ppc = pool_ref.shape[1]          # pooled positions handled this step
    c_out = wconv_ref.shape[1]

    @pl.when(k == 0)
    def _():
        h_sc[...] = jnp.zeros_like(h_sc)

    pool_c = pool_ref[0]             # (PPC, H*W)   bf16, chunk k of the pool matrix
    wconv = wconv_ref[...]           # (C_IN, C_OUT) bf16
    bconv = bconv_ref[...]           # (1, C_OUT)    f32

    # Pool + 1x1 conv for this chunk's pooled positions (lane-dense throughout).
    ys = []
    for i in range(n):
        xi = x_ref[i]                                                       # (H*W, C_IN) bf16
        pooled = jnp.dot(pool_c, xi, preferred_element_type=jnp.float32)    # (PPC, C_IN) f32
        pooled = jnp.maximum(pooled, 0.0)                                   # ReLU after AvgPool
        y = jnp.dot(pooled.astype(jnp.bfloat16), wconv,
                    preferred_element_type=jnp.float32)                     # (PPC, C_OUT)
        y = jnp.maximum(y + bconv, 0.0).astype(jnp.bfloat16)                # bias + ReLU, single cast
        ys.append(y)

    # FC LHS for this chunk: (n*PPC, C_OUT) -> (n, PPC*C_OUT); row-major order matches
    # the host-packed weight rows (global index p*C_OUT + c within chunk k).
    lhs = jnp.concatenate(ys, axis=0).reshape(n, ppc * c_out)               # (n, CH) bf16

    # Linear(2048 -> 1024), one MXU matmul per grid step, f32 accumulation.
    h_sc[...] += jnp.dot(lhs, w3_ref[...], preferred_element_type=jnp.float32)

    @pl.when(k == pl.num_programs(0) - 1)
    def _():
        h = h_sc[...] + bfc_ref[...]                                        # (n, HID) f32
        # Dropout(p=0.7): identity in eval mode.
        out = jnp.dot(h.astype(jnp.bfloat16), whead_ref[...],
                      preferred_element_type=jnp.float32) + bhead_ref[...]  # (n, 8)
        out_ref[...] = out.astype(out_ref.dtype)


# ------------------------- one-time parameter packing -------------------------
def pack_params(params):
    """Host-side, ONE-TIME re-layout of weights (kept out of the jitted hot path)."""
    pool_t = _build_pool_matrix().T.reshape(K_CHUNKS, PPC, H * W)           # (K, PPC, H*W)
    # FC weight (HID, FLAT), torch flat index = c*P + p  ->  rows p*C_OUT + c, bf16.
    w3 = jnp.transpose(params["w_fc"].reshape(HID, C_OUT, P),
                       (2, 1, 0)).reshape(FLAT, HID).astype(jnp.bfloat16)   # (2048, 1024)
    whead = jnp.concatenate(
        [params["w_xyz"].T, params["w_wpqr"].T, jnp.zeros((HID, 1), jnp.float32)],
        axis=1).astype(jnp.bfloat16)                                        # (1024, 8)
    bhead = jnp.concatenate(
        [params["b_xyz"], params["b_wpqr"], jnp.zeros((1,), jnp.float32)]
    ).reshape(1, HEADS)                                                     # (1, 8)
    return {
        "pool": jnp.asarray(pool_t, jnp.bfloat16),                          # (K, PPC, 196)
        "wconv": params["w_conv"].T.astype(jnp.bfloat16),                   # (512, 128)
        "bconv": params["b_conv"].reshape(1, C_OUT),                        # (1, 128) f32
        "w3": w3,                                                           # (2048, 1024) bf16
        "bfc": params["b_fc"].reshape(1, HID),                              # (1, 1024) f32
        "whead": whead,                                                     # (1024, 8) bf16
        "bhead": bhead,                                                     # (1, 8) f32
    }


# --------------------------------- wrapper ----------------------------------
@jax.jit
def loss_header_forward(x, packed):
    """x: (N, 512, 14, 14) NCHW float32.  Returns (xyz (N,3), wpqr (N,4))."""
    n = x.shape[0]

    # NCHW -> (N, H*W, C_IN); bf16 cast fused into the transpose output.
    # TODO(synk): if the producer can emit (N, H*W, C) bf16 directly, drop this op.
    x_t = jnp.transpose(x.reshape(n, C_IN, H * W), (0, 2, 1)).astype(jnp.bfloat16)

    out8 = pl.pallas_call(
        loss_header_kernel,
        out_shape=jax.ShapeDtypeStruct((n, HEADS), jnp.float32),
        grid=(K_CHUNKS,),
        in_specs=[
            pl.BlockSpec((n, H * W, C_IN), lambda k: (0, 0, 0)),   # x, resident across k
            pl.BlockSpec((1, PPC, H * W), lambda k: (k, 0, 0)),    # pool chunk k
            pl.BlockSpec((C_IN, C_OUT), lambda k: (0, 0)),         # conv weight
            pl.BlockSpec((1, C_OUT), lambda k: (0, 0)),            # conv bias
            pl.BlockSpec((CH, HID), lambda k: (k, 0)),             # FC weight chunk k (bf16)
            pl.BlockSpec((1, HID), lambda k: (0, 0)),              # FC bias
            pl.BlockSpec((HID, HEADS), lambda k: (0, 0)),          # fused head weight (bf16)
            pl.BlockSpec((1, HEADS), lambda k: (0, 0)),            # fused head bias
        ],
        out_specs=pl.BlockSpec((n, HEADS), lambda k: (0, 0)),
        scratch_shapes=[pltpu.VMEM((n, HID), jnp.float32)],        # h accumulator
        compiler_params=pltpu.CompilerParams(
            dimension_semantics=("arbitrary",),
            vmem_limit_bytes=16 * 1024 * 1024,
        ),
    )(x_t, packed["pool"], packed["wconv"], packed["bconv"],
      packed["w3"], packed["bfc"], packed["whead"], packed["bhead"])

    return out8[:, 0:3], out8[:, 3:7]


# ------------------------------ pure-JAX reference ------------------------------
def reference_forward(x, params):
    pooled = jax.lax.reduce_window(
        x, 0.0, jax.lax.add,
        window_dimensions=(1, 1, 5, 5),
        window_strides=(1, 1, 3, 3),
        padding="VALID") / 25.0
    pooled = jnp.maximum(pooled, 0.0)                              # (N, 512, 4, 4)
    y = jnp.einsum("oc,nchw->nohw", params["w_conv"], pooled)
    y = y + params["b_conv"][None, :, None, None]
    y = jnp.maximum(y, 0.0)                                        # (N, 128, 4, 4)
    feat = y.reshape(y.shape[0], -1)                               # (N, 2048)
    h = feat @ params["w_fc"].T + params["b_fc"]                   # (N, 1024)
    xyz = h @ params["w_xyz"].T + params["b_xyz"]
    wpqr = h @ params["w_wpqr"].T + params["b_wpqr"]
    return xyz, wpqr


# ------------------------------ deterministic init ------------------------------
def make_params(key):
    ks = jax.random.split(key, 8)
    s = 0.02
    return {
        "w_conv": s * jax.random.normal(ks[0], (C_OUT, C_IN), jnp.float32),
        "b_conv": s * jax.random.normal(ks[1], (C_OUT,), jnp.float32),
        "w_fc":   s * jax.random.normal(ks[2], (HID, FLAT), jnp.float32),
        "b_fc":   s * jax.random.normal(ks[3], (HID,), jnp.float32),
        "w_xyz":  s * jax.random.normal(ks[4], (3, HID), jnp.float32),
        "b_xyz":  s * jax.random.normal(ks[5], (3,), jnp.float32),
        "w_wpqr": s * jax.random.normal(ks[6], (4, HID), jnp.float32),
        "b_wpqr": s * jax.random.normal(ks[7], (4,), jnp.float32),
    }


if __name__ == "__main__":
    root = jax.random.PRNGKey(0)
    k_x, k_p = jax.random.split(root)
    x = jax.random.normal(k_x, (N, C_IN, H, W), jnp.float32)
    params = make_params(k_p)

    packed = pack_params(params)                 # one-time, outside the hot path
    xyz, wpqr = loss_header_forward(x, packed)
    jax.block_until_ready((xyz, wpqr))

    xyz_ref, wpqr_ref = reference_forward(x, params)
    assert xyz.shape == (N, 3) and wpqr.shape == (N, 4)
    # Pool / conv / FC / head matmuls use bf16 inputs with f32 accumulation.
    np.testing.assert_allclose(np.asarray(xyz), np.asarray(xyz_ref), atol=3e-3, rtol=3e-3)
    np.testing.assert_allclose(np.asarray(wpqr), np.asarray(wpqr_ref), atol=3e-3, rtol=3e-3)

    print("KERNEL_OK")
</pallas_src>

<mosaic_0001>
module attributes {stable_mosaic.version = 11 : i64} {
  func.func @loss_header_kernel(%arg0: i32, %arg1: memref<2x196x512xbf16, #tpu.memory_space<vmem>>, %arg2: memref<1x4x196xbf16, #tpu.memory_space<vmem>>, %arg3: memref<512x128xbf16, #tpu.memory_space<vmem>>, %arg4: memref<1x128xf32, #tpu.memory_space<vmem>>, %arg5: memref<512x1024xbf16, #tpu.memory_space<vmem>>, %arg6: memref<1x1024xf32, #tpu.memory_space<vmem>>, %arg7: memref<1024x8xbf16, #tpu.memory_space<vmem>>, %arg8: memref<1x8xf32, #tpu.memory_space<vmem>>, %arg9: memref<2x8xf32, #tpu.memory_space<vmem>>, %arg10: memref<2x1024xf32, #tpu.memory_space<vmem>>) attributes {dimension_semantics = [#tpu.dimension_semantics<arbitrary>], iteration_bounds = array<i64: 4>, scalar_prefetch = 0 : i64, scratch_operands = 1 : i64, tpu.core_type = #tpu.core_type<tc>, window_params = [{pipeline_mode = #tpu.pipeline_mode<synchronous>, transform_indices = @transform_0, window_bounds = array<i64: 2, 196, 512>}, {transform_indices = @transform_1, window_bounds = array<i64: 1, 4, 196>}, {pipeline_mode = #tpu.pipeline_mode<synchronous>, transform_indices = @transform_2, window_bounds = array<i64: 512, 128>}, {pipeline_mode = #tpu.pipeline_mode<synchronous>, transform_indices = @transform_3, window_bounds = array<i64: 1, 128>}, {transform_indices = @transform_4, window_bounds = array<i64: 512, 1024>}, {pipeline_mode = #tpu.pipeline_mode<synchronous>, transform_indices = @transform_5, window_bounds = array<i64: 1, 1024>}, {pipeline_mode = #tpu.pipeline_mode<synchronous>, transform_indices = @transform_6, window_bounds = array<i64: 1024, 8>}, {pipeline_mode = #tpu.pipeline_mode<synchronous>, transform_indices = @transform_7, window_bounds = array<i64: 1, 8>}, {pipeline_mode = #tpu.pipeline_mode<synchronous>, transform_indices = @transform_8, window_bounds = array<i64: 2, 8>}]} {
    %c0_i32 = arith.constant 0 : i32
    %0 = arith.cmpi eq, %arg0, %c0_i32 : i32
    %1 = arith.extui %0 : i1 to i32
    %c0_i32_0 = arith.constant 0 : i32
    %2 = arith.cmpi ne, %1, %c0_i32_0 : i32
    scf.if %2 {
      %cst_27 = arith.constant 0.000000e+00 : f32
      %41 = vector.broadcast %cst_27 : f32 to vector<2x1024xf32>
      %c0_28 = arith.constant 0 : index
      %c0_29 = arith.constant 0 : index
      %42 = vector.load %arg10[%c0_28, %c0_29] : memref<2x1024xf32, #tpu.memory_space<vmem>>, vector<2x1024xf32>
      tpu.vector_store %arg10[%c0_28, %c0_29], %41 {strides = array<i32>} : memref<2x1024xf32, #tpu.memory_space<vmem>>, vector<2x1024xf32>,
    } else {
    }
    %c0 = arith.constant 0 : index
    %c0_1 = arith.constant 0 : index
    %c0_2 = arith.constant 0 : index
    %3 = vector.load %arg2[%c0, %c0_1, %c0_2] : memref<1x4x196xbf16, #tpu.memory_space<vmem>>, vector<1x4x196xbf16>
    %4 = vector.shape_cast %3 : vector<1x4x196xbf16> to vector<4x196xbf16>
    %c0_3 = arith.constant 0 : index
    %c0_4 = arith.constant 0 : index
    %5 = vector.load %arg3[%c0_3, %c0_4] : memref<512x128xbf16, #tpu.memory_space<vmem>>, vector<512x128xbf16>
    %c0_5 = arith.constant 0 : index
    %c0_6 = arith.constant 0 : index
    %6 = vector.load %arg4[%c0_5, %c0_6] : memref<1x128xf32, #tpu.memory_space<vmem>>, vector<1x128xf32>
    %c0_7 = arith.constant 0 : index
    %c0_8 = arith.constant 0 : index
    %c0_9 = arith.constant 0 : index
    %7 = vector.load %arg1[%c0_7, %c0_8, %c0_9] : memref<2x196x512xbf16, #tpu.memory_space<vmem>>, vector<1x196x512xbf16>
    %8 = vector.shape_cast %7 : vector<1x196x512xbf16> to vector<196x512xbf16>
    %cst = arith.constant dense<0.000000e+00> : vector<4x512xf32>
    %9 = tpu.matmul %4, %8, %cst {dimension_numbers = #tpu.dot_dimension_numbers<[1], [0], [0], [1], [0, 0, 1, 1], [], []>} : vector<4x196xbf16>, vector<196x512xbf16>, vector<4x512xf32> -> vector<4x512xf32>
    %cst_10 = arith.constant 0.000000e+00 : f32
    %10 = vector.broadcast %cst_10 : f32 to vector<4x512xf32>
    %11 = arith.maximumf %9, %10 : vector<4x512xf32>
    %12 = arith.truncf %11 : vector<4x512xf32> to vector<4x512xbf16>
    %cst_11 = arith.constant dense<0.000000e+00> : vector<4x128xf32>
    %13 = tpu.matmul %12, %5, %cst_11 {dimension_numbers = #tpu.dot_dimension_numbers<[1], [0], [0], [1], [0, 0, 1, 1], [], []>} : vector<4x512xbf16>, vector<512x128xbf16>, vector<4x128xf32> -> vector<4x128xf32>
    %14 = vector.broadcast %6 : vector<1x128xf32> to vector<4x128xf32>
    %15 = arith.addf %13, %14 : vector<4x128xf32>
    %cst_12 = arith.constant 0.000000e+00 : f32
    %16 = vector.broadcast %cst_12 : f32 to vector<4x128xf32>
    %17 = arith.maximumf %15, %16 : vector<4x128xf32>
    %18 = arith.truncf %17 : vector<4x128xf32> to vector<4x128xbf16>
    %c1 = arith.constant 1 : index
    %c0_13 = arith.constant 0 : index
    %c0_14 = arith.constant 0 : index
    %19 = vector.load %arg1[%c1, %c0_13, %c0_14] : memref<2x196x512xbf16, #tpu.memory_space<vmem>>, vector<1x196x512xbf16>
    %20 = vector.shape_cast %19 : vector<1x196x512xbf16> to vector<196x512xbf16>
    %cst_15 = arith.constant dense<0.000000e+00> : vector<4x512xf32>
    %21 = tpu.matmul %4, %20, %cst_15 {dimension_numbers = #tpu.dot_dimension_numbers<[1], [0], [0], [1], [0, 0, 1, 1], [], []>} : vector<4x196xbf16>, vector<196x512xbf16>, vector<4x512xf32> -> vector<4x512xf32>
    %cst_16 = arith.constant 0.000000e+00 : f32
    %22 = vector.broadcast %cst_16 : f32 to vector<4x512xf32>
    %23 = arith.maximumf %21, %22 : vector<4x512xf32>
    %24 = arith.truncf %23 : vector<4x512xf32> to vector<4x512xbf16>
    %cst_17 = arith.constant dense<0.000000e+00> : vector<4x128xf32>
    %25 = tpu.matmul %24, %5, %cst_17 {dimension_numbers = #tpu.dot_dimension_numbers<[1], [0], [0], [1], [0, 0, 1, 1], [], []>} : vector<4x512xbf16>, vector<512x128xbf16>, vector<4x128xf32> -> vector<4x128xf32>
    %26 = vector.broadcast %6 : vector<1x128xf32> to vector<4x128xf32>
    %27 = arith.addf %25, %26 : vector<4x128xf32>
    %cst_18 = arith.constant 0.000000e+00 : f32
    %28 = vector.broadcast %cst_18 : f32 to vector<4x128xf32>
    %29 = arith.maximumf %27, %28 : vector<4x128xf32>
    %30 = arith.truncf %29 : vector<4x128xf32> to vector<4x128xbf16>
    %31 = tpu.concatenate %18, %30 in 0 : vector<4x128xbf16>, vector<4x128xbf16> -> vector<8x128xbf16>
    %32 = vector.shape_cast %31 : vector<8x128xbf16> to vector<2x512xbf16>
    %c0_19 = arith.constant 0 : index
    %c0_20 = arith.constant 0 : index
    %33 = vector.load %arg10[%c0_19, %c0_20] : memref<2x1024xf32, #tpu.memory_space<vmem>>, vector<2x1024xf32>
    %c0_21 = arith.constant 0 : index
    %c0_22 = arith.constant 0 : index
    %34 = vector.load %arg5[%c0_21, %c0_22] : memref<512x1024xbf16, #tpu.memory_space<vmem>>, vector<512x1024xbf16>
    %cst_23 = arith.constant dense<0.000000e+00> : vector<2x1024xf32>
    %35 = tpu.matmul %32, %34, %cst_23 {dimension_numbers = #tpu.dot_dimension_numbers<[1], [0], [0], [1], [0, 0, 1, 1], [], []>} : vector<2x512xbf16>, vector<512x1024xbf16>, vector<2x1024xf32> -> vector<2x1024xf32>
    %36 = arith.addf %33, %35 : vector<2x1024xf32>
    %c0_24 = arith.constant 0 : index
    %c0_25 = arith.constant 0 : index
    %37 = vector.load %arg10[%c0_24, %c0_25] : memref<2x1024xf32, #tpu.memory_space<vmem>>, vector<2x1024xf32>
    tpu.vector_store %arg10[%c0_24, %c0_25], %36 {strides = array<i32>} : memref<2x1024xf32, #tpu.memory_space<vmem>>, vector<2x1024xf32>,
    %c3_i32 = arith.constant 3 : i32
    %38 = arith.cmpi eq, %arg0, %c3_i32 : i32
    %39 = arith.extui %38 : i1 to i32
    %c0_i32_26 = arith.constant 0 : i32
    %40 = arith.cmpi ne, %39, %c0_i32_26 : i32
    scf.if %40 {
      %c0_27 = arith.constant 0 : index
      %c0_28 = arith.constant 0 : index
      %41 = vector.load %arg10[%c0_27, %c0_28] : memref<2x1024xf32, #tpu.memory_space<vmem>>, vector<2x1024xf32>
      %c0_29 = arith.constant 0 : index
      %c0_30 = arith.constant 0 : index
      %42 = vector.load %arg6[%c0_29, %c0_30] : memref<1x1024xf32, #tpu.memory_space<vmem>>, vector<1x1024xf32>
      %43 = vector.broadcast %42 : vector<1x1024xf32> to vector<2x1024xf32>
      %44 = arith.addf %41, %43 : vector<2x1024xf32>
      %45 = arith.truncf %44 : vector<2x1024xf32> to vector<2x1024xbf16>
      %c0_31 = arith.constant 0 : index
      %c0_32 = arith.constant 0 : index
      %46 = vector.load %arg7[%c0_31, %c0_32] : memref<1024x8xbf16, #tpu.memory_space<vmem>>, vector<1024x8xbf16>
      %cst_33 = arith.constant dense<0.000000e+00> : vector<2x8xf32>
      %47 = tpu.matmul %45, %46, %cst_33 {dimension_numbers = #tpu.dot_dimension_numbers<[1], [0], [0], [1], [0, 0, 1, 1], [], []>} : vector<2x1024xbf16>, vector<1024x8xbf16>, vector<2x8xf32> -> vector<2x8xf32>
      %c0_34 = arith.constant 0 : index
      %c0_35 = arith.constant 0 : index
      %48 = vector.load %arg8[%c0_34, %c0_35] : memref<1x8xf32, #tpu.memory_space<vmem>>, vector<1x8xf32>
      %49 = vector.broadcast %48 : vector<1x8xf32> to vector<2x8xf32>
      %50 = arith.addf %47, %49 : vector<2x8xf32>
      %c0_36 = arith.constant 0 : index
      %c0_37 = arith.constant 0 : index
      %51 = vector.load %arg9[%c0_36, %c0_37] : memref<2x8xf32, #tpu.memory_space<vmem>>, vector<2x8xf32>
      tpu.vector_store %arg9[%c0_36, %c0_37], %50 {strides = array<i32>} : memref<2x8xf32, #tpu.memory_space<vmem>>, vector<2x8xf32>,
    } else {
    }
    return
  }
  func.func @transform_0(%arg0: i32) -> (i32, i32, i32) {
    %c0_i32 = arith.constant 0 : i32
    %c0_i32_0 = arith.constant 0 : i32
    %c0_i32_1 = arith.constant 0 : i32
    %c0_i32_2 = arith.constant 0 : i32
    return %c0_i32, %c0_i32_0, %c0_i32_1 : i32, i32, i32
  }
  func.func @transform_1(%arg0: i32) -> (i32, i32, i32) {
    %c0_i32 = arith.constant 0 : i32
    %c0_i32_0 = arith.constant 0 : i32
    %c0_i32_1 = arith.constant 0 : i32
    return %arg0, %c0_i32, %c0_i32_0 : i32, i32, i32
  }
  func.func @transform_2(%arg0: i32) -> (i32, i32) {
    %c0_i32 = arith.constant 0 : i32
    %c0_i32_0 = arith.constant 0 : i32
    %c0_i32_1 = arith.constant 0 : i32
    return %c0_i32, %c0_i32_0 : i32, i32
  }
  func.func @transform_3(%arg0: i32) -> (i32, i32) {
    %c0_i32 = arith.constant 0 : i32
    %c0_i32_0 = arith.constant 0 : i32
    %c0_i32_1 = arith.constant 0 : i32
    return %c0_i32, %c0_i32_0 : i32, i32
  }
  func.func @transform_4(%arg0: i32) -> (i32, i32) {
    %c0_i32 = arith.constant 0 : i32
    %c0_i32_0 = arith.constant 0 : i32
    return %arg0, %c0_i32 : i32, i32
  }
  func.func @transform_5(%arg0: i32) -> (i32, i32) {
    %c0_i32 = arith.constant 0 : i32
    %c0_i32_0 = arith.constant 0 : i32
    %c0_i32_1 = arith.constant 0 : i32
    return %c0_i32, %c0_i32_0 : i32, i32
  }
  func.func @transform_6(%arg0: i32) -> (i32, i32) {
    %c0_i32 = arith.constant 0 : i32
    %c0_i32_0 = arith.constant 0 : i32
    %c0_i32_1 = arith.constant 0 : i32
    return %c0_i32, %c0_i32_0 : i32, i32
  }
  func.func @transform_7(%arg0: i32) -> (i32, i32) {
    %c0_i32 = arith.constant 0 : i32
    %c0_i32_0 = arith.constant 0 : i32
    %c0_i32_1 = arith.constant 0 : i32
    return %c0_i32, %c0_i32_0 : i32, i32
  }
  func.func @transform_8(%arg0: i32) -> (i32, i32) {
    %c0_i32 = arith.constant 0 : i32
    %c0_i32_0 = arith.constant 0 : i32
    %c0_i32_1 = arith.constant 0 : i32
    return %c0_i32, %c0_i32_0 : i32, i32
  }
}

</mosaic_0001>

<bundles_post_ra>
// kernel: loss_header_forward.1
= control target key start
LH: loop header
LB: loop body
LE: loop exit
PB: predicated region body
PF: predicated region fallthrough
CT: control target
= control target key end

     0   :  { %s7129_s0 = inlined_call_operand.vmem [shape: bf16[2,196,512], index: 0, kind: input, shape index: {}]   ;;  %s7130_s1 = inlined_call_operand.hbm [shape: bf16[4,4,196], index: 1, kind: input, shape index: {}]   ;;  %s7131_s2 = inlined_call_operand.hbm [shape: bf16[512,128], index: 2, kind: input, shape index: {}]   ;;  %s7132_s3 = inlined_call_operand.hbm [shape: f32[1,128], index: 3, kind: input, shape index: {}]   ;;  %s7133_s4 = inlined_call_operand.hbm [shape: bf16[2048,1024], index: 4, kind: input, shape index: {}]   ;;  %s7134_s5 = inlined_call_operand.hbm [shape: f32[1,1024], index: 5, kind: input, shape index: {}]   ;;  %s7135_s6 = inlined_call_operand.vmem [shape: bf16[1024,8], index: 6, kind: input, shape index: {}]   ;;  %s7136_s7 = inlined_call_operand.hbm [shape: f32[1,8], index: 7, kind: input, shape index: {}]   ;;  %s7137_s8 = inlined_call_operand.vmem [shape: f32[2,8], index: 8, kind: output, shape index: {}]  }
   0x1   :  { %7140 = sst [smem:[#allocation18_spill]] %s7130_s1 }
   0x2   :  { %13 = vsyncpa [#allocation4], 0 }
   0x3   :  { %15 = vsyncpa [#allocation4 + $0x1], 0 }
   0x4   :  { %16 = vsyncpa [#allocation6], 0 }
   0x5   :  { %17 = vsyncpa [#allocation9], 0 }
   0x6   :  { %19 = vsyncpa [#allocation9 + $0x1], 0 }
   0x7   :  { %20 = vsyncpa [#allocation12], 0  ;;  %s5876_s27 = smov 0   ;;  %s5878_s28 = smov 0  }
   0x8   :  { %s5880_s29 = smov 0   ;;  %s5882_s30 = smov 0  }
   0x9 LB: > { %s5819_s9 = smov [#allocation5]   ;;  %s5897_s11 = sadd.s32 4294967295, %s5817_s30   ;;  %s5817_s30 = sphi %s5882_s30, %s7159_s30   ;;  %s5813_s29 = sphi %s5880_s29, %s7158_s29   ;;  %s5809_s28 = sphi %s5878_s28, %s7157_s28   ;;  %s5805_s27 = sphi %s5876_s27, %s7156_s27  }
   0xa   : > { %s245_s10 = sshll.u32 %s5819_s9, 4  ;;  %p4517_p0 = scmp.ge.s32.totalorder %s5817_s30, 1  ;;  %s5903_s10 = int_to_ptr.vmem [resolvable:$true] %s245_s10 }
   0xb   : > { %p7138_p1 = scmp.eq.s32.totalorder %s5897_s11, 0  ;;  %p230_p2 = scmp.lt.s32.totalorder %s5817_s30, 5 }
   0xc   : > { %s5820_s13 = smov [#allocation10]   ;;  %s5821_s16 = smov [#allocation7]  }
   0xd   : > { %p5905_p4 = pnand %p4517_p0, %p230_p2  ;;  %s270_s14 = sshll.u32 %s5820_s13, 4  ;;  %s5917_s14 = int_to_ptr.vmem [resolvable:$true] %s270_s14 }
   0xe   : > { %s259_s17 = sshll.u32 %s5821_s16, 4  ;;  %s5595_s20 = scalar_lea.hbm %s7131_s2, 4096  ;;  %s5919_s17 = int_to_ptr.vmem [resolvable:$true] %s259_s17 }
   0xf   : > { %s7141_s12 = scalar_select %p5905_p4, 1, 0 }
  0x10   : > { %p5276_p5 = pneg %p5905_p4  ;;  %p5596_p7 = scmp.ne.s32.totalorder %s7131_s2, %s5595_s20 }
  0x11   : > { %p5602_p11 = scmp.lt.u32.totalorder %s5595_s20, %s7131_s2 }
  0x12   : > { %p5913_p6 = pnand %p5276_p5, %p7138_p1 }
  0x14   : > { %p5929_p8 = pneg %p5913_p6 }
  0x16   : > { %p5598_p9 = pnand %p5929_p8, %p5596_p7 }
  0x18   : > { %p5599_p10 = pneg %p5598_p9 }
  0x1a   : > { %p5604_p12 = pnand %p5602_p11, %p5599_p10 }
  0x1c   : > { %5607 = shalt.err (!%p5604_p12)
}
  0x1d   : > { %s5608_s26 = scalar_lea.vmem %s5903_s10, 4096  ;;  %p5616_p5 = scmp.lt.s32.totalorder %s5903_s10, %s5903_s10 }
  0x1e   : > { %p5609_p13 = scmp.ne.s32.totalorder %s5903_s10, %s5608_s26  ;;  %p5617_p3 = scmp.lt.s32.totalorder %s5608_s26, %s5608_s26 }
  0x20   : > { %p5611_p0 = pnand %p5609_p13, %p5929_p8  ;;  %p5618_p7 = por %p5617_p3, %p5616_p5 }
  0x22   : > { %p5612_p2 = pneg %p5611_p0 }
  0x24   : > { %p5619_p9 = pnand %p5618_p7, %p5612_p2 }
  0x26   : > { %5622 = shalt.err (!%p5619_p9)
}
  0x27   : > { %s5822_s9 = smov 64   ;;  %s5823_s13 = smov 4  }
  0x28   : > { %5279 = dma.hbm_to_vmem [thread:$0]  (!%p5913_p6), %s7131_s2, 4096, %s5903_s10, [#allocation6], %s5822_s9, %s5822_s9, %s5823_s13  }
  0x29   : > { %s5623_s21 = scalar_lea.hbm %s7134_s5, 128 }
  0x2a   : > { %p5624_p3 = scmp.ne.s32.totalorder %s7134_s5, %s5623_s21  ;;  %p5630_p12 = scmp.lt.u32.totalorder %s5623_s21, %s7134_s5 }
  0x2c   : > { %p5626_p10 = pnand %p5624_p3, %p5929_p8 }
  0x2e   : > { %p5627_p11 = pneg %p5626_p10 }
  0x30   : > { %p5632_p13 = pnand %p5630_p12, %p5627_p11 }
  0x32   : > { %5635 = shalt.err (!%p5632_p13)
}
  0x33   : > { %s5636_s10 = scalar_lea.vmem %s5917_s14, 128  ;;  %p5644_p7 = scmp.lt.s32.totalorder %s5917_s14, %s5917_s14 }
  0x34   : > { %p5637_p0 = scmp.ne.s32.totalorder %s5917_s14, %s5636_s10  ;;  %p5645_p9 = scmp.lt.s32.totalorder %s5636_s10, %s5636_s10 }
  0x36   : > { %p5639_p2 = pnand %p5637_p0, %p5929_p8  ;;  %p5646_p3 = por %p5645_p9, %p5644_p7 }
  0x38   : > { %p5640_p5 = pneg %p5639_p2 }
  0x3a   : > { %p5647_p10 = pnand %p5646_p3, %p5640_p5 }
  0x3c   : > { %5650 = shalt.err (!%p5647_p10)
}
  0x3d   : > { %5285 = dma.hbm_to_vmem [thread:$0]  (!%p5913_p6), %s7134_s5, 128, %s5917_s14, [#allocation9]  }
  0x3e   : > { %s5651_s19 = scalar_lea.hbm %s7132_s3, 16 }
  0x3f   : > { %p5652_p11 = scmp.ne.s32.totalorder %s7132_s3, %s5651_s19  ;;  %p5658_p0 = scmp.lt.u32.totalorder %s5651_s19, %s7132_s3 }
  0x41   : > { %p5654_p12 = pnand %p5652_p11, %p5929_p8 }
  0x43   : > { %p5655_p13 = pneg %p5654_p12 }
  0x45   : > { %p5660_p2 = pnand %p5658_p0, %p5655_p13 }
  0x47   : > { %5663 = shalt.err (!%p5660_p2)
}
  0x48   : > { %s5664_s14 = scalar_lea.vmem %s5919_s17, 16  ;;  %s5671_s25 = scalar_lea.vmem %s5919_s17, 32 }
  0x49   : > { %p5665_p5 = scmp.ne.s32.totalorder %s5919_s17, %s5664_s14  ;;  %p5672_p3 = scmp.lt.s32.totalorder %s5919_s17, %s5919_s17 }
  0x4a   : > { %p5673_p10 = scmp.lt.s32.totalorder %s5671_s25, %s5664_s14 }
  0x4b   : > { %p5667_p7 = pnand %p5665_p5, %p5929_p8 }
  0x4c   : > { %p5674_p11 = por %p5673_p10, %p5672_p3 }
  0x4d   : > { %p5668_p9 = pneg %p5667_p7 }
  0x4f   : > { %p5675_p12 = pnand %p5674_p11, %p5668_p9 }
  0x51   : > { %5678 = shalt.err (!%p5675_p12)
}
  0x52   : > { %5282 = dma.hbm_to_vmem [thread:$0]  (!%p5913_p6), %s7132_s3, 16, %s5919_s17, [#allocation6]  }
  0x53   : > { %s5824_s9 = smov [#allocation11]   ;;  %s5679_s19 = scalar_lea.hbm %s7136_s7, 16 }
  0x54   : > { %s284_s13 = sshll.u32 %s5824_s9, 4  ;;  %p5680_p13 = scmp.ne.s32.totalorder %s7136_s7, %s5679_s19  ;;  %s285_s13 = int_to_ptr.vmem [resolvable:$true] %s284_s13 }
  0x55   : > { %p5686_p5 = scmp.lt.u32.totalorder %s5679_s19, %s7136_s7 }
  0x56   : > { %p5682_p0 = pnand %p5680_p13, %p5929_p8 }
  0x58   : > { %p5683_p2 = pneg %p5682_p0 }
  0x5a   : > { %p5688_p7 = pnand %p5686_p5, %p5683_p2 }
  0x5c   : > { %5691 = shalt.err (!%p5688_p7)
}
  0x5d   : > { %s5692_s17 = scalar_lea.vmem %s285_s13, 16  ;;  %s5699_s14 = scalar_lea.vmem %s285_s13, 32 }
  0x5e   : > { %p5693_p9 = scmp.ne.s32.totalorder %s285_s13, %s5692_s17  ;;  %p5700_p11 = scmp.lt.s32.totalorder %s285_s13, %s285_s13 }
  0x5f   : > { %p5701_p12 = scmp.lt.s32.totalorder %s5699_s14, %s5692_s17 }
  0x60   : > { %p5695_p3 = pnand %p5693_p9, %p5929_p8 }
  0x61   : > { %p5702_p1 = por %p5701_p12, %p5700_p11 }
  0x62   : > { %p5696_p10 = pneg %p5695_p3 }
  0x64   : > { %p5703_p4 = pnand %p5702_p1, %p5696_p10 }
  0x66   : > { %5706 = shalt.err (!%p5703_p4)
}
  0x67   : > { %5288 = dma.hbm_to_vmem [thread:$0]  (!%p5913_p6), %s7136_s7, 16, %s285_s13, [#allocation12]  }
  0x68   : > { %s6016_s23 = sadd.s32 1, %s5817_s30   ;;  %s54_s15 = sadd.s32 1, %s5813_s29 }
  0x69   : > { %s51_s10 = ssub.s32 %s5817_s30, %s6016_s23  ;;  %p61_p1 = scmp.ne.s32.totalorder %s5813_s29, %s5809_s28 }
  0x6a   : > { %p52_p4 = scmp.eq.s32.totalorder %s51_s10, 0  ;;  %p62_p8 = scmp.eq.s32.totalorder %s5817_s30, 0 }
  0x6b   : > { %p67_p13 = scmp.ne.s32.totalorder %s5809_s28, %s5805_s27  ;;  %p5300_p0 = scmp.lt.s32.totalorder %s5817_s30, 4 }
  0x6c   : > { %s6028_s9 = scalar_select %p52_p4, %s5813_s29, %s54_s15  }
  0x6d   : > { %p63_p2 = por %p62_p8, %p61_p1  ;;  %p7144_p5 = scmp.eq.s32.totalorder %s5897_s11, 0 }
  0x6e   : > { %s6037_s18 = sand.u32 1, %s5813_s29   ;;  %s5061_s13 = sshll.u32 %s5817_s30, 6 }
  0x6f   : > { %p6032_p7 = por %p7144_p5, %p67_p13  ;;  %s4523_s19 = sshll.u32 %s6037_s18, 2 }
  0x70   : > { %s7146_s1 = sld [smem:[#allocation18_spill]]  ;;  %s299_s22 = scalar_lea.vmem [#allocation3], %s4523_s19 }
  0x71   : > { %s307_s24 = sshll.u32 %s299_s22, 4  ;;  %p6046_p6 = pnand %p5300_p0, %p63_p2  ;;  %s6050_s24 = int_to_ptr.vmem [resolvable:$true] %s307_s24 }
  0x72   : > { %s4526_s14 = sshll.u32 %s6037_s18, 11  ;;  %s296_s25 = scalar_lea.sflag [#allocation4], %s6037_s18 }
  0x73   : > { %p5709_p3 = pneg %p6046_p6 }
  0x76   : > { %s6044_s27 = scalar_lea.hbm %s7146_s1, %s5061_s13  ;;  %s5712_s13 = scalar_lea.hbm %s7146_s1, 256 }
  0x77   : > { %s5707_s26 = scalar_lea.hbm %s6044_s27, 64  ;;  %p5713_p12 = scmp.lt.u32.totalorder %s6044_s27, %s7146_s1 }
  0x78   : > { %p5708_p9 = scmp.ne.s32.totalorder %s6044_s27, %s5707_s26  ;;  %p5714_p1 = scmp.lt.u32.totalorder %s5712_s13, %s5707_s26 }
  0x79   : > { %p5716_p8 = scmp.lt.u32.totalorder %s5707_s26, %s6044_s27 }
  0x7a   : > { %p5710_p10 = pnand %p5709_p3, %p5708_p9  ;;  %p5715_p4 = por %p5714_p1, %p5713_p12 }
  0x7c   : > { %p5711_p11 = pneg %p5710_p10  ;;  %p5717_p13 = por %p5716_p8, %p5715_p4 }
  0x7e   : > { %p5718_p0 = pnand %p5717_p13, %p5711_p11 }
  0x80   : > { %5721 = shalt.err (!%p5718_p0)
}
  0x81   : > { %s5722_s21 = scalar_lea.vmem %s6050_s24, 64  ;;  %s5825_s22 = smov [#allocation3]  }
  0x82   : > { %p5723_p2 = scmp.ne.s32.totalorder %s6050_s24, %s5722_s21  ;;  %s5727_s15 = sshll.u32 %s5825_s22, 4  ;;  %s5728_s15 = int_to_ptr.vmem [resolvable:$false] %s5727_s15 }
  0x83   : > { %s5729_s10 = scalar_lea.vmem %s5728_s15, 128  ;;  %p5730_p10 = scmp.lt.s32.totalorder %s6050_s24, %s5728_s15 }
  0x84   : > { %p5725_p5 = pnand %p5723_p2, %p5709_p3  ;;  %p5731_p12 = scmp.lt.s32.totalorder %s5729_s10, %s5722_s21 }
  0x86   : > { %p5726_p9 = pneg %p5725_p5  ;;  %p5732_p1 = por %p5731_p12, %p5730_p10 }
  0x88   : > { %p5733_p4 = pnand %p5732_p1, %p5726_p9 }
  0x8a   : > { %5736 = shalt.err (!%p5733_p4)
}
  0x8b   : > { %5292 = dma.hbm_to_vmem [thread:$0]  (!%p6046_p6), %s6044_s27, 64, %s6050_s24, %s296_s25  }
  0x8c   : > { %s318_s26 = scalar_lea.vmem [#allocation8], %s4526_s14  ;;  %s314_s19 = sand.u32 1, %s5817_s30  }
  0x8d   : > { %s326_s13 = sshll.u32 %s318_s26, 4  ;;  %s5063_s20 = sshll.u32 %s5817_s30, 15  ;;  %s6082_s13 = int_to_ptr.vmem [resolvable:$true] %s326_s13 }
  0x8e   : > { %s6088_s15 = scalar_lea.hbm %s7133_s4, %s5063_s20  ;;  %s6090_s10 = scalar_lea.sflag [#allocation9], %s314_s19 }
  0x8f   : > { %s5737_s1 = scalar_lea.hbm %s6088_s15, 32768  ;;  %s5742_s30 = scalar_lea.hbm %s7133_s4, 131072 }
  0x90   : > { %p5738_p11 = scmp.ne.s32.totalorder %s6088_s15, %s5737_s1  ;;  %p5743_p0 = scmp.lt.u32.totalorder %s6088_s15, %s7133_s4 }
  0x91   : > { %p5744_p2 = scmp.lt.u32.totalorder %s5742_s30, %s5737_s1  ;;  %p5746_p9 = scmp.lt.u32.totalorder %s5737_s1, %s6088_s15 }
  0x92   : > { %p5740_p8 = pnand %p5738_p11, %p5709_p3 }
  0x93   : > { %p5745_p5 = por %p5744_p2, %p5743_p0 }
  0x94   : > { %p5741_p13 = pneg %p5740_p8 }
  0x95   : > { %p5747_p10 = por %p5746_p9, %p5745_p5 }
  0x97   : > { %p5748_p12 = pnand %p5747_p10, %p5741_p13 }
  0x99   : > { %5751 = shalt.err (!%p5748_p12)
}
  0x9a   : > { %s5752_s25 = scalar_lea.vmem %s6082_s13, 32768  ;;  %s5826_s26 = smov [#allocation8]  }
  0x9b   : > { %p5753_p1 = scmp.ne.s32.totalorder %s6082_s13, %s5752_s25  ;;  %s5757_s19 = sshll.u32 %s5826_s26, 4  ;;  %s5758_s19 = int_to_ptr.vmem [resolvable:$false] %s5757_s19 }
  0x9c   : > { %s5759_s20 = scalar_lea.vmem %s5758_s19, 65536  ;;  %p5760_p8 = scmp.lt.s32.totalorder %s6082_s13, %s5758_s19 }
  0x9d   : > { %p5755_p4 = pnand %p5753_p1, %p5709_p3  ;;  %p5761_p0 = scmp.lt.s32.totalorder %s5759_s20, %s5752_s25 }
  0x9f   : > { %p5756_p11 = pneg %p5755_p4  ;;  %p5762_p2 = por %p5761_p0, %p5760_p8 }
  0xa1   : > { %p5763_p5 = pnand %p5762_p2, %p5756_p11 }
  0xa3   : > { %5766 = shalt.err (!%p5763_p5)
}
  0xa4   : > { %s5827_s1 = smov 512   ;;  %s5828_s21 = smov 32  }
  0xa5   : > { %5295 = dma.hbm_to_vmem [thread:$0]  (!%p6046_p6), %s6088_s15, 32768, %s6082_s13, %s6090_s10, %s5827_s1, %s5827_s1, %s5828_s21  }
  0xa6   : > { %p7148_p3 = scmp.ne.s32.totalorder %s7141_s12, 0 }
  0xa7   : > { %s340_s22 = sand.u32 (!%p7148_p3), 1, %s5809_s28  }
  0xa8   : > { %338 = sbr.rel (%p7148_p3) target bundleno = 1646 (0x66e), region = 52  ;;  %s4531_s18 = sshll.u32 (!%p7148_p3), %s340_s22, 2 }
  0xa9   : > { %s341_s27 = scalar_lea.sflag (!%p7148_p3), [#allocation4], %s340_s22  ;;  %s6119_s30 = scalar_lea.vmem (!%p7148_p3), [#allocation3], %s4531_s18 }
  0xaf   : > { %5784 = dma.done.wait (%p6032_p7), %s341_s27, 64  }
  0xb0   : > { %5786 = vsyncadd (%p6032_p7), %s341_s27, 4294967232  ;;  %p7149_p13 = scmp.eq.s32.totalorder %s5897_s11, 0 }
  0xb2   : > { %5788 = dma.done.wait (%p7149_p13), [#allocation6], 4112   ;;  %p7150_p6 = pmov %p7149_p13 }
  0xb3   : > { %s357_s12 = sand.u32 1, %s5897_s11   ;;  %s4534_s17 = sshll.u32 %s340_s22, 11 }
  0xb4   : > { %5790 = vsyncadd (%p7150_p6), [#allocation6], 4294963184  ;;  %s358_s13 = scalar_lea.sflag [#allocation9], %s357_s12  ;;  %s6130_s15 = scalar_lea.vmem [#allocation8], %s4534_s17 }
  0xb5   : > { %5792 = dma.done.wait (%p6032_p7), %s358_s13, 32768  }
  0xb6   : > { %5794 = vsyncadd (%p6032_p7), %s358_s13, 4294934528  ;;  %p7151_p9 = pmov %p7150_p6 }
  0xb7   : > { %p7152_p10 = pmov %p7150_p6 }
  0xb8   : > { %5796 = dma.done.wait (%p7151_p9), [#allocation9], 128  }
  0xb9   : > { %5798 = vsyncadd (%p7152_p10), [#allocation9], 4294967168  ;;  %p7153_p12 = pmov %p7150_p6 }
  0xba   : > { %p7154_p1 = pmov %p7150_p6 }
  0xbb   : > { %5800 = dma.done.wait (%p7153_p12), [#allocation12], 16  }
  0xbc   : > { %5802 = vsyncadd (%p7154_p1), [#allocation12], 4294967280  ;;  %p7155_p4 = scmp.ne.s32.totalorder %s5897_s11, 0 }
  0xbd   : > { %v5829_v0 = vmov (!%p7155_p4), 0.0  }
  0xbe   : > { %407 = sbr.rel (%p7155_p4) target bundleno = 197 (0xc5), region = 80  ;;  %408 = vst [vmem:[#allocation2] sm:$0xff] (!%p7155_p4), %v5829_v0  ;;  %409 = vst [vmem:[#allocation2 + $0x8] sm:$0xff] (!%p7155_p4), %v5829_v0 }
  0xc5 PF: > { %v5347_v1 = vld [vmem:[%s7129_s0 + $0x4] ss:$16 sps:$4 sm:$0xff]   ;;  %v5349_v2 = vld [vmem:[%s7129_s0 + $0xc] ss:$16 sps:$4 sm:$0xff]   ;;  %v5351_v3 = vld [vmem:[%s7129_s0] ss:$16 sps:$4 sm:$0xff]  }
  0xc6   : > { %803 = vmatprep.subr.bf16.mxu0 %v5347_v1  ;;  %v5352_v4 = vld [vmem:[%s7129_s0 + $0x8] ss:$16 sps:$4 sm:$0xff]   ;;  %844 = vmatprep.subr.bf16.mxu1 %v5349_v2  ;;  %v5353_v5 = vld [vmem:[%s7129_s0 + $0x24] ss:$16 sps:$4 sm:$0xff]   ;;  %v5355_v6 = vld [vmem:[%s7129_s0 + $0x2c] ss:$16 sps:$4 sm:$0xff]  }
  0xc7   : > { %804 = vmatpush1.bf16.msra.mxu0 %v5351_v3  ;;  %845 = vmatpush1.bf16.msra.mxu1 %v5352_v4  ;;  %v5357_v7 = vld [vmem:[%s7129_s0 + $0x20] ss:$16 sps:$4 sm:$0xff]   ;;  %v5358_v8 = vld [vmem:[%s7129_s0 + $0x28] ss:$16 sps:$4 sm:$0xff]   ;;  %v5359_v9 = vld [vmem:[%s7129_s0 + $0x44] ss:$16 sps:$4 sm:$0xff]  }
  0xc8   : > { %805 = vmatprep.subr.bf16.mxu0 %v5353_v5  ;;  %846 = vmatprep.subr.bf16.mxu1 %v5355_v6  ;;  %v5361_v10 = vld [vmem:[%s7129_s0 + $0x4c] ss:$16 sps:$4 sm:$0xff]   ;;  %v5363_v11 = vld [vmem:[%s7129_s0 + $0x40] ss:$16 sps:$4 sm:$0xff]   ;;  %v5364_v12 = vld [vmem:[%s7129_s0 + $0x48] ss:$16 sps:$4 sm:$0xff]  }
  0xc9   : > { %v5365_v13 = vld [vmem:[%s7129_s0 + $0x64] ss:$16 sps:$4 sm:$0xff]   ;;  %v5367_v14 = vld [vmem:[%s7129_s0 + $0x6c] ss:$16 sps:$4 sm:$0xff]   ;;  %v5369_v15 = vld [vmem:[%s7129_s0 + $0x60] ss:$16 sps:$4 sm:$0xff]  }
  0xca   : > { %v5370_v16 = vld [vmem:[%s7129_s0 + $0x68] ss:$16 sps:$4 sm:$0xff]   ;;  %v5371_v17 = vld [vmem:[%s7129_s0 + $0x84] ss:$16 sps:$4 sm:$0xff]   ;;  %v5373_v18 = vld [vmem:[%s7129_s0 + $0x8c] ss:$16 sps:$4 sm:$0xff]  }
  0xcb   : > { %806 = vmatpush1.bf16.msra.mxu0 %v5357_v7  ;;  %847 = vmatpush1.bf16.msra.mxu1 %v5358_v8  ;;  %v5375_v19 = vld [vmem:[%s7129_s0 + $0x80] ss:$16 sps:$4 sm:$0xff]   ;;  %v5376_v20 = vld [vmem:[%s7129_s0 + $0x88] ss:$16 sps:$4 sm:$0xff]   ;;  %v5377_v21 = vld [vmem:[%s7129_s0 + $0xa4] ss:$16 sps:$4 sm:$0xff]  }
  0xcc   : > { %807 = vmatprep.subr.bf16.mxu0 %v5359_v9  ;;  %848 = vmatprep.subr.bf16.mxu1 %v5361_v10  ;;  %v5379_v22 = vld [vmem:[%s7129_s0 + $0xac] ss:$16 sps:$4 sm:$0xff]   ;;  %v5381_v23 = vld [vmem:[%s7129_s0 + $0xa0] ss:$16 sps:$4 sm:$0xff]   ;;  %v5382_v24 = vld [vmem:[%s7129_s0 + $0xa8] ss:$16 sps:$4 sm:$0xff]  }
  0xcd   : > { %v5383_v25 = vld [vmem:[%s7129_s0 + $0xc4] ss:$16 sps:$4 sm:$0xff]   ;;  %v5385_v26 = vld [vmem:[%s7129_s0 + $0xcc] ss:$16 sps:$4 sm:$0xff]   ;;  %v5387_v27 = vld [vmem:[%s7129_s0 + $0xc0] ss:$16 sps:$4 sm:$0xff]  }
  0xce   : > { %v5388_v28 = vld [vmem:[%s7129_s0 + $0xc8] ss:$16 sps:$4 sm:$0xff]   ;;  %v5389_v29 = vld [vmem:[%s7129_s0 + $0xe4] ss:$16 sps:$4 sm:$0xff]   ;;  %v5391_v30 = vld [vmem:[%s7129_s0 + $0xec] ss:$16 sps:$4 sm:$0xff]  }
  0xcf   : > { %808 = vmatpush1.bf16.msra.mxu0 %v5363_v11  ;;  %849 = vmatpush1.bf16.msra.mxu1 %v5364_v12  ;;  %v5393_v31 = vld [vmem:[%s7129_s0 + $0xe0] ss:$16 sps:$4 sm:$0xff]   ;;  %v5394_v32 = vld [vmem:[%s7129_s0 + $0xe8] ss:$16 sps:$4 sm:$0xff]   ;;  %v5395_v33 = vld [vmem:[%s7129_s0 + $0x104] ss:$16 sps:$4 sm:$0xff]  }
  0xd0   : > { %809 = vmatprep.subr.bf16.mxu0 %v5365_v13  ;;  %850 = vmatprep.subr.bf16.mxu1 %v5367_v14  ;;  %v5397_v34 = vld [vmem:[%s7129_s0 + $0x10c] ss:$16 sps:$4 sm:$0xff]   ;;  %v5399_v35 = vld [vmem:[%s7129_s0 + $0x100] ss:$16 sps:$4 sm:$0xff]   ;;  %v5400_v36 = vld [vmem:[%s7129_s0 + $0x108] ss:$16 sps:$4 sm:$0xff]  }
  0xd1   : > { %vm786_vm0 = vcmask 556032   ;;  %v5401_v37 = vld [vmem:[%s7129_s0 + $0x124] ss:$16 sps:$4 sm:$0xff]   ;;  %v5403_v38 = vld [vmem:[%s7129_s0 + $0x12c] ss:$16 sps:$4 sm:$0xff]   ;;  %vm790_vm1 = vcmask 1041408  }
  0xd2   : > { %v6261_v39 = vld.sshfl [vmem:[%s6119_s30] sm:$0x33 pattern:$0x76325410]  ;;  %v5406_v42 = vld [vmem:[%s7129_s0 + $0x128] ss:$16 sps:$4 sm:$0xff]  }
  0xd3   : > { %810 = vmatpush1.bf16.msra.mxu0 %v5369_v15  ;;  %851 = vmatpush1.bf16.msra.mxu1 %v5370_v16  ;;  %v5405_v40 = vld [vmem:[%s7129_s0 + $0x120] ss:$16 sps:$4 sm:$0xff]   ;;  %v6268_v41 = vcombine.high %v6261_v39, %v6261_v39  ;;  %v5407_v43 = vld [vmem:[%s7129_s0 + $0x144] ss:$16 sps:$4 sm:$0xff]   ;;  %v5409_v44 = vld [vmem:[%s7129_s0 + $0x14c] ss:$16 sps:$4 sm:$0xff]  }
  0xd4   : > { %811 = vmatprep.subr.bf16.mxu0 %v5371_v17  ;;  %852 = vmatprep.subr.bf16.mxu1 %v5373_v18  ;;  %v5411_v45 = vld [vmem:[%s7129_s0 + $0x140] ss:$16 sps:$4 sm:$0xff]   ;;  %v5412_v46 = vld [vmem:[%s7129_s0 + $0x148] ss:$16 sps:$4 sm:$0xff]   ;;  %v5413_v47 = vld [vmem:[%s7129_s0 + $0x164] ss:$16 sps:$4 sm:$0xff]  }
  0xd5   : > { %4592 = vmatprep.mubr.msk.bf16.mxu0 %vm786_vm0, %v6268_v41  ;;  %4594 = vmatprep.mubr.msk.bf16.mxu1 %vm786_vm0, %v6268_v41  ;;  %v5415_v48 = vld [vmem:[%s7129_s0 + $0x16c] ss:$16 sps:$4 sm:$0xff]   ;;  %v524_v49 = vld [vmem:[%s7129_s0 + $0x180] sm:$0x33]  ;;  %v5418_v52 = vld [vmem:[%s7129_s0 + $0x168] ss:$16 sps:$4 sm:$0xff]  }
  0xd6   : > { %v525_v50 = vld [vmem:[%s7129_s0 + $0x188] sm:$0x33]  ;;  %v5417_v51 = vld [vmem:[%s7129_s0 + $0x160] ss:$16 sps:$4 sm:$0xff]   ;;  %v4587_v53 = vcombine.low %v524_v49, %v524_v49  ;;  %v4588_v54 = vcombine.high %v524_v49, %v524_v49  ;;  %v6308_v58 = vld [vmem:[#allocation5 + $0x40] sm:$0xff]   ;;  %p4993_p7 = scmp.ne.s32.totalorder %s5897_s11, 3 }
  0xd7   : > { %812 = vmatpush1.bf16.msra.mxu0 %v5375_v19  ;;  %853 = vmatpush1.bf16.msra.mxu1 %v5376_v20  ;;  %v4590_v55 = vcombine.high %v525_v50, %v525_v50  ;;  %v4589_v56 = vcombine.low %v525_v50, %v525_v50  ;;  %v6313_v60 = vld [vmem:[#allocation5 + $0xc0] sm:$0xff]   ;;  %v6319_v63 = vld [vmem:[#allocation5 + $0x48] sm:$0xff]   ;;  %v6333_v3 = vld [vmem:[#allocation5 + $0x50] sm:$0xff]   ;;  %vm4414_vm2 = vcmask (!%p4993_p7), 58368  }
  0xd8   : > { %813 = vmatprep.subr.bf16.mxu0 %v5377_v21  ;;  %854 = vmatprep.subr.bf16.mxu1 %v5379_v22  ;;  %v792_v57 = vsel %vm790_vm1, %v4587_v53, 0  ;;  %v6315_v61 = vld [vmem:[#allocation5] sm:$0xff]   ;;  %v6323_v0 = vld [vmem:[#allocation5 + $0xc8] sm:$0xff]   ;;  %v6337_v4 = vld [vmem:[#allocation5 + $0xd0] sm:$0xff]  }
  0xd9   : > { %v798_v59 = vsel %vm790_vm1, %v4589_v56, 0  ;;  %v6317_v62 = vld [vmem:[#allocation5 + $0x80] sm:$0xff]   ;;  %v6325_v1 = vld [vmem:[#allocation5 + $0x8] sm:$0xff]   ;;  %v6339_v5 = vld [vmem:[#allocation5 + $0x10] sm:$0xff]  }
  0xda   : > { %v6329_v2 = vld [vmem:[#allocation5 + $0x88] sm:$0xff]   ;;  %v6341_v6 = vld [vmem:[#allocation5 + $0x90] sm:$0xff]   ;;  %v6345_v7 = vld [vmem:[#allocation5 + $0x58] sm:$0xff]  }
  0xdb   : > { %814 = vmatpush1.bf16.msra.mxu0 %v5381_v23  ;;  %855 = vmatpush1.bf16.msra.mxu1 %v5382_v24  ;;  %v6349_v8 = vld [vmem:[#allocation5 + $0xd8] sm:$0xff]   ;;  %v6355_v11 = vld [vmem:[#allocation5 + $0x60] sm:$0xff]   ;;  %v6367_v15 = vld [vmem:[#allocation5 + $0x68] sm:$0xff]  }
  0xdc   : > { %815 = vmatprep.subr.bf16.mxu0 %v5383_v25  ;;  %856 = vmatprep.subr.bf16.mxu1 %v5385_v26  ;;  %v6351_v9 = vld [vmem:[#allocation5 + $0x18] sm:$0xff]   ;;  %v6357_v12 = vld [vmem:[#allocation5 + $0xe0] sm:$0xff]   ;;  %v6369_v16 = vld [vmem:[#allocation5 + $0xe8] sm:$0xff]  }
  0xdd   : > { %v6353_v10 = vld [vmem:[#allocation5 + $0x98] sm:$0xff]   ;;  %v6363_v13 = vld [vmem:[#allocation5 + $0x20] sm:$0xff]   ;;  %v6375_v17 = vld [vmem:[#allocation5 + $0x28] sm:$0xff]  }
  0xde   : > { %v6365_v14 = vld [vmem:[#allocation5 + $0xa0] sm:$0xff]   ;;  %v6377_v18 = vld [vmem:[#allocation5 + $0xa8] sm:$0xff]   ;;  %v6379_v19 = vld [vmem:[#allocation5 + $0x70] sm:$0xff]  }
  0xdf   : > { %816 = vmatpush1.bf16.msra.mxu0 %v5387_v27  ;;  %857 = vmatpush1.bf16.msra.mxu1 %v5388_v28  ;;  %v6381_v20 = vld [vmem:[#allocation5 + $0xf0] sm:$0xff]   ;;  %v6397_v23 = vld [vmem:[#allocation5 + $0x78] sm:$0xff]  }
  0xe0   : > { %817 = vmatprep.subr.bf16.mxu0 %v5389_v29  ;;  %858 = vmatprep.subr.bf16.mxu1 %v5391_v30  ;;  %v6387_v21 = vld [vmem:[#allocation5 + $0x30] sm:$0xff]   ;;  %v6399_v24 = vld [vmem:[#allocation5 + $0xf8] sm:$0xff]  }
  0xe1   : > { %v6389_v22 = vld [vmem:[#allocation5 + $0xb0] sm:$0xff]   ;;  %v6401_v25 = vld [vmem:[#allocation5 + $0x38] sm:$0xff]  }
  0xe2   : > { %v6403_v26 = vld [vmem:[#allocation5 + $0xb8] sm:$0xff]   ;;  %v5460_v28 = vld [vmem:[%s7129_s0 + $0x19c] ss:$16 sps:$4 sm:$0xff]   ;;  %v5470_v56 = vld [vmem:[%s7129_s0 + $0x1d8] ss:$16 sps:$4 sm:$0xff]  }
  0xe3   : > { %818 = vmatpush1.bf16.msra.mxu0 %v5393_v31  ;;  %859 = vmatpush1.bf16.msra.mxu1 %v5394_v32  ;;  %v5457_v27 = vld [vmem:[%s7129_s0 + $0x194] ss:$16 sps:$4 sm:$0xff]   ;;  %v5466_v50 = vld [vmem:[%s7129_s0 + $0x1bc] ss:$16 sps:$4 sm:$0xff]  }
  0xe4   : > { %819 = vmatprep.subr.bf16.mxu0 %v5395_v33  ;;  %860 = vmatprep.subr.bf16.mxu1 %v5397_v34  ;;  %v5463_v49 = vld [vmem:[%s7129_s0 + $0x1b4] ss:$16 sps:$4 sm:$0xff]  }
  0xe5   : > { %v5469_v53 = vld [vmem:[%s7129_s0 + $0x1d4] ss:$16 sps:$4 sm:$0xff]  }
  0xe7   : > { %820 = vmatpush1.bf16.msra.mxu0 %v5399_v35  ;;  %861 = vmatpush1.bf16.msra.mxu1 %v5400_v36 }
  0xe8   : > { %821 = vmatprep.subr.bf16.mxu0 %v5401_v37  ;;  %862 = vmatprep.subr.bf16.mxu1 %v5403_v38 }
  0xeb   : > { %822 = vmatpush1.bf16.msra.mxu0 %v5405_v40  ;;  %863 = vmatpush1.bf16.msra.mxu1 %v5406_v42 }
  0xec   : > { %823 = vmatprep.subr.bf16.mxu0 %v5407_v43  ;;  %864 = vmatprep.subr.bf16.mxu1 %v5409_v44 }
  0xef   : > { %824 = vmatpush1.bf16.msra.mxu0 %v5411_v45  ;;  %865 = vmatpush1.bf16.msra.mxu1 %v5412_v46  ;;  %v5455_v46 = vld [vmem:[%s7129_s0 + $0x190] ss:$16 sps:$4 sm:$0xff]  }
  0xf0   : > { %825 = vmatprep.subr.bf16.mxu0 %v5413_v47  ;;  %866 = vmatprep.subr.bf16.mxu1 %v5415_v48  ;;  %v5458_v47 = vld [vmem:[%s7129_s0 + $0x198] ss:$16 sps:$4 sm:$0xff]  }
  0xf3   : > { %826 = vmatpush1.bf16.msra.mxu0 %v5417_v51  ;;  %867 = vmatpush1.bf16.msra.mxu1 %v5418_v52  ;;  %v5461_v51 = vld [vmem:[%s7129_s0 + $0x1b0] ss:$16 sps:$4 sm:$0xff]   ;;  %v5464_v52 = vld [vmem:[%s7129_s0 + $0x1b8] ss:$16 sps:$4 sm:$0xff]  }
  0xf4   : > { %4591 = vmatprep.subr.msk.bf16.mxu0 %vm790_vm1, %v4588_v54  ;;  %4593 = vmatprep.subr.msk.bf16.mxu1 %vm790_vm1, %v4590_v55  ;;  %v5472_v54 = vld [vmem:[%s7129_s0 + $0x1dc] ss:$16 sps:$4 sm:$0xff]   ;;  %v5467_v55 = vld [vmem:[%s7129_s0 + $0x1d0] ss:$16 sps:$4 sm:$0xff]  }
  0xf7   : > { %828 = vmatpush1.bf16.msra.mxu0 %v792_v57  ;;  %869 = vmatpush1.bf16.msra.mxu1 %v798_v59  ;;  %v5475_v57 = vld [vmem:[%s7129_s0 + $0x1f4] ss:$16 sps:$4 sm:$0xff]   ;;  %v5473_v59 = vld [vmem:[%s7129_s0 + $0x1f0] ss:$16 sps:$4 sm:$0xff]  }
  0xf8   : > { %5064 = vmatprep.subr.bf16.mxu0 %v6308_v58  ;;  %5086 = vmatprep.subr.bf16.mxu1 %v6313_v60 }
  0xfa   : > { %836 = vmatmul.mubr.bf16.vlgmr.msra.gmra.mrb[0].mxu0 %v6261_v39  ;;  %877 = vmatmul.mubr.bf16.vlgmr.msra.gmra.mrb[0].mxu1 %v6261_v39 }
  0xfb   : > { %5065 = vmatpush3.bf16.msra.mxu0 %v6315_v61  ;;  %5087 = vmatpush3.bf16.msra.mxu1 %v6317_v62 }
  0xfc   : > { %5066 = vmatprep.subr.bf16.mxu0 %v6319_v63  ;;  %5088 = vmatprep.subr.bf16.mxu1 %v6323_v0 }
  0xff   : > { %5067 = vmatpush3.bf16.msra.mxu0 %v6325_v1  ;;  %5089 = vmatpush3.bf16.msra.mxu1 %v6329_v2 }
 0x100   : > { %5068 = vmatprep.subr.bf16.mxu0 %v6333_v3  ;;  %5090 = vmatprep.subr.bf16.mxu1 %v6337_v4 }
 0x103   : > { %5069 = vmatpush3.bf16.msra.mxu0 %v6339_v5  ;;  %5091 = vmatpush3.bf16.msra.mxu1 %v6341_v6 }
 0x104   : > { %5070 = vmatprep.subr.bf16.mxu0 %v6345_v7  ;;  %5092 = vmatprep.subr.bf16.mxu1 %v6349_v8 }
 0x107   : > { %5071 = vmatpush3.bf16.msra.mxu0 %v6351_v9  ;;  %5093 = vmatpush3.bf16.msra.mxu1 %v6353_v10 }
 0x108   : > { %5072 = vmatprep.subr.bf16.mxu0 %v6355_v11  ;;  %5094 = vmatprep.subr.bf16.mxu1 %v6357_v12 }
 0x10b   : > { %5073 = vmatpush3.bf16.msra.mxu0 %v6363_v13  ;;  %5095 = vmatpush3.bf16.msra.mxu1 %v6365_v14 }
 0x10c   : > { %5074 = vmatprep.subr.bf16.mxu0 %v6367_v15  ;;  %5096 = vmatprep.subr.bf16.mxu1 %v6369_v16 }
 0x10f   : > { %5075 = vmatpush3.bf16.msra.mxu0 %v6375_v17  ;;  %5097 = vmatpush3.bf16.msra.mxu1 %v6377_v18 }
 0x110   : > { %5076 = vmatprep.subr.bf16.mxu0 %v6379_v19  ;;  %5098 = vmatprep.subr.bf16.mxu1 %v6381_v20 }
 0x113   : > { %5077 = vmatpush3.bf16.msra.mxu0 %v6387_v21  ;;  %5099 = vmatpush3.bf16.msra.mxu1 %v6389_v22 }
 0x114   : > { %5078 = vmatprep.subr.bf16.mxu0 %v6397_v23  ;;  %5100 = vmatprep.subr.bf16.mxu1 %v6399_v24 }
 0x117   : > { %5079 = vmatpush3.bf16.msra.mxu0 %v6401_v25  ;;  %5101 = vmatpush3.bf16.msra.mxu1 %v6403_v26 }
 0x118   : > { %1486 = vmatprep.subr.bf16.mxu0 %v5457_v27  ;;  %1527 = vmatprep.subr.bf16.mxu1 %v5460_v28  ;;  %v5476_v27 = vld [vmem:[%s7129_s0 + $0x1f8] ss:$16 sps:$4 sm:$0xff]   ;;  %v5481_v28 = vld [vmem:[%s7129_s0 + $0x214] ss:$16 sps:$4 sm:$0xff]  }
 0x1cd   : > { %v837_v29 = vpop.f32.mrb[0].mxu0  ;;  %v878_v30 = vpop.f32.mrb[0].mxu1 }
 0x1ce   : > { %v885_v31 = vmax.f32 %v837_v29, 0.0  ;;  %v887_v32 = vmax.f32 %v878_v30, 0.0  ;;  %v839_v33 = vpop.f32.mrb[1].mxu0  ;;  %v880_v34 = vpop.f32.mrb[1].mxu1  ;;  %v5484_v29 = vld [vmem:[%s7129_s0 + $0x21c] ss:$16 sps:$4 sm:$0xff]  }
 0x1cf   : > { %v886_v35 = vmax.f32 %v839_v33, 0.0  ;;  %v888_v36 = vmax.f32 %v880_v34, 0.0  ;;  %v841_v37 = vpop.f32.mrb[2].mxu0  ;;  %v882_v38 = vpop.f32.mrb[2].mxu1  ;;  %v5479_v30 = vld [vmem:[%s7129_s0 + $0x210] ss:$16 sps:$4 sm:$0xff]  }
 0x1d0   : > { %v891_v40 = vpack.c.bf16 %v887_v32, %v887_v32  ;;  %v842_v42 = vpop.f32.mrb[3].mxu0  ;;  %v883_v43 = vpop.f32.mrb[3].mxu1  ;;  %v889_v48 = vpack.c.bf16 %v885_v31, %v885_v31  ;;  %v5482_v31 = vld [vmem:[%s7129_s0 + $0x218] ss:$16 sps:$4 sm:$0xff]   ;;  %v5487_v32 = vld [vmem:[%s7129_s0 + $0x234] ss:$16 sps:$4 sm:$0xff]  }
 0x1d1   : > { %v890_v44 = vpack.c.bf16 %v886_v35, %v886_v35  ;;  %v892_v45 = vpack.c.bf16 %v888_v36, %v888_v36  ;;  %v5490_v33 = vld [vmem:[%s7129_s0 + $0x23c] ss:$16 sps:$4 sm:$0xff]   ;;  %v5485_v34 = vld [vmem:[%s7129_s0 + $0x230] ss:$16 sps:$4 sm:$0xff]   ;;  %v5488_v35 = vld [vmem:[%s7129_s0 + $0x238] ss:$16 sps:$4 sm:$0xff]  }
 0x1d2   : > { %v5493_v36 = vld [vmem:[%s7129_s0 + $0x254] ss:$16 sps:$4 sm:$0xff]   ;;  %v5496_v37 = vld [vmem:[%s7129_s0 + $0x25c] ss:$16 sps:$4 sm:$0xff]   ;;  %v5491_v38 = vld [vmem:[%s7129_s0 + $0x250] ss:$16 sps:$4 sm:$0xff]  }
 0x1d3   : > { %1123 = vmatprep.mubr.bf16.mxu0 %v890_v44  ;;  %1163 = vmatprep.mubr.bf16.mxu1 %v892_v45  ;;  %v5499_v42 = vld [vmem:[%s7129_s0 + $0x274] ss:$16 sps:$4 sm:$0xff]   ;;  %v5502_v43 = vld [vmem:[%s7129_s0 + $0x27c] ss:$16 sps:$4 sm:$0xff]   ;;  %v5497_v44 = vld [vmem:[%s7129_s0 + $0x270] ss:$16 sps:$4 sm:$0xff]  }
 0x1d4   : > { %1124 = vmatmul.mubr.bf16.vlgmr.msra.gmra.mrb[4].mxu0 %v889_v48  ;;  %1164 = vmatmul.mubr.bf16.vlgmr.msra.gmra.mrb[4].mxu1 %v891_v40  ;;  %v5494_v40 = vld [vmem:[%s7129_s0 + $0x258] ss:$16 sps:$4 sm:$0xff]   ;;  %v5503_v48 = vld [vmem:[%s7129_s0 + $0x290] ss:$16 sps:$4 sm:$0xff]  }
 0x1d5   : > { %1487 = vmatpush1.bf16.msra.mxu0 %v5455_v46  ;;  %1528 = vmatpush1.bf16.msra.mxu1 %v5458_v47  ;;  %v5500_v45 = vld [vmem:[%s7129_s0 + $0x278] ss:$16 sps:$4 sm:$0xff]   ;;  %v5505_v46 = vld [vmem:[%s7129_s0 + $0x294] ss:$16 sps:$4 sm:$0xff]   ;;  %v5508_v47 = vld [vmem:[%s7129_s0 + $0x29c] ss:$16 sps:$4 sm:$0xff]  }
 0x1d6   : > { %1488 = vmatprep.subr.bf16.mxu0 %v5463_v49  ;;  %1529 = vmatprep.subr.bf16.mxu1 %v5466_v50  ;;  %v5506_v49 = vld [vmem:[%s7129_s0 + $0x298] ss:$16 sps:$4 sm:$0xff]   ;;  %v5511_v50 = vld [vmem:[%s7129_s0 + $0x2b4] ss:$16 sps:$4 sm:$0xff]  }
 0x1d7   : > { %4731 = vmatprep.mubr.msk.bf16.mxu0 %vm786_vm0, %v6268_v41  ;;  %4733 = vmatprep.mubr.msk.bf16.mxu1 %vm786_vm0, %v6268_v41  ;;  %v5478_v41 = vld [vmem:[%s7129_s0 + $0x1fc] ss:$16 sps:$4 sm:$0xff]  }
 0x1d9   : > { %1489 = vmatpush1.bf16.msra.mxu0 %v5461_v51  ;;  %1530 = vmatpush1.bf16.msra.mxu1 %v5464_v52  ;;  %v5514_v51 = vld [vmem:[%s7129_s0 + $0x2bc] ss:$16 sps:$4 sm:$0xff]   ;;  %v5509_v52 = vld [vmem:[%s7129_s0 + $0x2b0] ss:$16 sps:$4 sm:$0xff]  }
 0x1da   : > { %1490 = vmatprep.subr.bf16.mxu0 %v5469_v53  ;;  %1531 = vmatprep.subr.bf16.mxu1 %v5472_v54  ;;  %v5512_v53 = vld [vmem:[%s7129_s0 + $0x2b8] ss:$16 sps:$4 sm:$0xff]   ;;  %v5517_v54 = vld [vmem:[%s7129_s0 + $0x2d4] ss:$16 sps:$4 sm:$0xff]  }
 0x1dd   : > { %1491 = vmatpush1.bf16.msra.mxu0 %v5467_v55  ;;  %1532 = vmatpush1.bf16.msra.mxu1 %v5470_v56  ;;  %v5520_v55 = vld [vmem:[%s7129_s0 + $0x2dc] ss:$16 sps:$4 sm:$0xff]   ;;  %v5515_v56 = vld [vmem:[%s7129_s0 + $0x2d0] ss:$16 sps:$4 sm:$0xff]  }
 0x1de   : > { %1492 = vmatprep.subr.bf16.mxu0 %v5475_v57  ;;  %1533 = vmatprep.subr.bf16.mxu1 %v5478_v41  ;;  %v5518_v57 = vld [vmem:[%s7129_s0 + $0x2d8] ss:$16 sps:$4 sm:$0xff]   ;;  %v5523_v41 = vld [vmem:[%s7129_s0 + $0x2f4] ss:$16 sps:$4 sm:$0xff]  }
 0x1e1   : > { %1493 = vmatpush1.bf16.msra.mxu0 %v5473_v59  ;;  %1534 = vmatpush1.bf16.msra.mxu1 %v5476_v27  ;;  %v5526_v59 = vld [vmem:[%s7129_s0 + $0x2fc] ss:$16 sps:$4 sm:$0xff]   ;;  %v4676_v27 = vld [vmem:[%s7129_s0 + $0x310] sm:$0x33] }
 0x1e2   : > { %1494 = vmatprep.subr.bf16.mxu0 %v5481_v28  ;;  %1535 = vmatprep.subr.bf16.mxu1 %v5484_v29  ;;  %v4677_v28 = vld [vmem:[%s7129_s0 + $0x318] sm:$0x33]  ;;  %v5521_v29 = vld [vmem:[%s7129_s0 + $0x2f0] ss:$16 sps:$4 sm:$0xff]  }
 0x1e5   : > { %1495 = vmatpush1.bf16.msra.mxu0 %v5479_v30  ;;  %1536 = vmatpush1.bf16.msra.mxu1 %v5482_v31  ;;  %v5524_v30 = vld [vmem:[%s7129_s0 + $0x2f8] ss:$16 sps:$4 sm:$0xff]   ;;  %v4727_v31 = vcombine.high %v4676_v27, %v4676_v27 }
 0x1e6   : > { %1496 = vmatprep.subr.bf16.mxu0 %v5487_v32  ;;  %1537 = vmatprep.subr.bf16.mxu1 %v5490_v33  ;;  %v4729_v32 = vcombine.high %v4677_v28, %v4677_v28  ;;  %v4726_v33 = vcombine.low %v4676_v27, %v4676_v27  ;;  %v1701_v27 = vld [vmem:[%s6130_s15 + $0xe8] sm:$0xff] }
 0x1e9   : > { %1497 = vmatpush1.bf16.msra.mxu0 %v5485_v34  ;;  %1538 = vmatpush1.bf16.msra.mxu1 %v5488_v35  ;;  %v4728_v34 = vcombine.low %v4677_v28, %v4677_v28  ;;  %v1475_v35 = vsel %vm790_vm1, %v4726_v33, 0  ;;  %v1708_v33 = vld [vmem:[%s6130_s15 + $0x120] sm:$0xff] }
 0x1ea   : > { %1498 = vmatprep.subr.bf16.mxu0 %v5493_v36  ;;  %1539 = vmatprep.subr.bf16.mxu1 %v5496_v37  ;;  %v1681_v37 = vld [vmem:[%s6130_s15 + $0x48] sm:$0xff] }
 0x1eb   : > { %v1481_v36 = vsel %vm790_vm1, %v4728_v34, 0  ;;  %v1705_v34 = vld [vmem:[%s6130_s15 + $0x108] sm:$0xff] }
 0x1ed   : > { %1499 = vmatpush1.bf16.msra.mxu0 %v5491_v38  ;;  %1540 = vmatpush1.bf16.msra.mxu1 %v5494_v40  ;;  %v1685_v38 = vld [vmem:[%s6130_s15 + $0x68] sm:$0xff] }
 0x1ee   : > { %1500 = vmatprep.subr.bf16.mxu0 %v5499_v42  ;;  %1541 = vmatprep.subr.bf16.mxu1 %v5502_v43 }
 0x1f1   : > { %1501 = vmatpush1.bf16.msra.mxu0 %v5497_v44  ;;  %1542 = vmatpush1.bf16.msra.mxu1 %v5500_v45 }
 0x1f2   : > { %1502 = vmatprep.subr.bf16.mxu0 %v5505_v46  ;;  %1543 = vmatprep.subr.bf16.mxu1 %v5508_v47 }
 0x1f5   : > { %1503 = vmatpush1.bf16.msra.mxu0 %v5503_v48  ;;  %1544 = vmatpush1.bf16.msra.mxu1 %v5506_v49  ;;  %v4748_v48 = vcombine.high %v1681_v37, %v1685_v38  ;;  %v1688_v49 = vld [vmem:[%s6130_s15 + $0x80] sm:$0xff] }
 0x1f6   : > { %1504 = vmatprep.subr.bf16.mxu0 %v5511_v50  ;;  %1545 = vmatprep.subr.bf16.mxu1 %v5514_v51  ;;  %v1692_v50 = vld [vmem:[%s6130_s15 + $0xa0] sm:$0xff]  ;;  %v1689_v51 = vld [vmem:[%s6130_s15 + $0x88] sm:$0xff] }
 0x1f7   : > { %v4753_v28 = vcombine.low %v1688_v49, %v1692_v50 }
 0x1f9   : > { %1505 = vmatpush1.bf16.msra.mxu0 %v5509_v52  ;;  %1546 = vmatpush1.bf16.msra.mxu1 %v5512_v53  ;;  %v1693_v52 = vld [vmem:[%s6130_s15 + $0xa8] sm:$0xff] }
 0x1fa   : > { %1506 = vmatprep.subr.bf16.mxu0 %v5517_v54  ;;  %1547 = vmatprep.subr.bf16.mxu1 %v5520_v55  ;;  %v4747_v54 = vcombine.low %v1681_v37, %v1685_v38  ;;  %v4754_v55 = vcombine.high %v1688_v49, %v1692_v50 }
 0x1fd   : > { %1507 = vmatpush1.bf16.msra.mxu0 %v5515_v56  ;;  %1548 = vmatpush1.bf16.msra.mxu1 %v5518_v57  ;;  %v4756_v56 = vcombine.high %v1689_v51, %v1693_v52  ;;  %v1696_v57 = vld [vmem:[%s6130_s15 + $0xc0] sm:$0xff] }
 0x1fe   : > { %1508 = vmatprep.subr.bf16.mxu0 %v5523_v41  ;;  %1549 = vmatprep.subr.bf16.mxu1 %v5526_v59  ;;  %v1700_v41 = vld [vmem:[%s6130_s15 + $0xe0] sm:$0xff]  ;;  %v1697_v59 = vld [vmem:[%s6130_s15 + $0xc8] sm:$0xff] }
 0x201   : > { %1509 = vmatpush1.bf16.msra.mxu0 %v5521_v29  ;;  %1550 = vmatpush1.bf16.msra.mxu1 %v5524_v30  ;;  %v4755_v29 = vcombine.low %v1689_v51, %v1693_v52  ;;  %v4762_v30 = vcombine.high %v1696_v57, %v1700_v41 }
 0x202   : > { %4730 = vmatprep.subr.msk.bf16.mxu0 %vm790_vm1, %v4727_v31  ;;  %4732 = vmatprep.subr.msk.bf16.mxu1 %vm790_vm1, %v4729_v32  ;;  %v4764_v31 = vcombine.high %v1697_v59, %v1701_v27  ;;  %v1704_v32 = vld [vmem:[%s6130_s15 + $0x100] sm:$0xff] }
 0x205   : > { %1511 = vmatpush1.bf16.msra.mxu0 %v1475_v35  ;;  %1552 = vmatpush1.bf16.msra.mxu1 %v1481_v36  ;;  %v1709_v35 = vld [vmem:[%s6130_s15 + $0x128] sm:$0xff]  ;;  %v4761_v36 = vcombine.low %v1696_v57, %v1700_v41 }
 0x206   : > { %5108 = vmatprep.subr.bf16.mxu0 %v6308_v58  ;;  %5130 = vmatprep.subr.bf16.mxu1 %v6313_v60  ;;  %v1676_v58 = vld [vmem:[%s6130_s15 + $0x20] sm:$0xff]  ;;  %v1673_v60 = vld [vmem:[%s6130_s15 + $0x8] sm:$0xff] }
 0x207   : > { %v1757_v57 = vld [vmem:[%s6130_s15 + $0x2a8] sm:$0xff] }
 0x208   : > { %1519 = vmatmul.mubr.bf16.vlgmr.msra.gmra.mrb[8].mxu0 %v6261_v39  ;;  %1560 = vmatmul.mubr.bf16.vlgmr.msra.gmra.mrb[8].mxu1 %v6261_v39  ;;  %v1672_v39 = vld [vmem:[%s6130_s15] sm:$0xff] }
 0x209   : > { %5109 = vmatpush3.bf16.msra.mxu0 %v6315_v61  ;;  %5131 = vmatpush3.bf16.msra.mxu1 %v6317_v62  ;;  %v4737_v61 = vcombine.low %v1672_v39, %v1676_v58  ;;  %v4738_v62 = vcombine.high %v1672_v39, %v1676_v58  ;;  %v4763_v39 = vcombine.low %v1697_v59, %v1701_v27 }
 0x20a   : > { %5110 = vmatprep.subr.bf16.mxu0 %v6319_v63  ;;  %5132 = vmatprep.subr.bf16.mxu1 %v6323_v0  ;;  %v1677_v63 = vld [vmem:[%s6130_s15 + $0x28] sm:$0xff]  ;;  %v4770_v58 = vcombine.high %v1704_v32, %v1708_v33 }
 0x20b   : > { %v4739_v0 = vcombine.low %v1673_v60, %v1677_v63 }
 0x20d   : > { %5111 = vmatpush3.bf16.msra.mxu0 %v6325_v1  ;;  %5133 = vmatpush3.bf16.msra.mxu1 %v6329_v2  ;;  %v4740_v1 = vcombine.high %v1673_v60, %v1677_v63  ;;  %v4772_v60 = vcombine.high %v1705_v34, %v1709_v35  ;;  %v1713_v63 = vld [vmem:[%s6130_s15 + $0x148] sm:$0xff] }
 0x20e   : > { %5112 = vmatprep.subr.bf16.mxu0 %v6333_v3  ;;  %5134 = vmatprep.subr.bf16.mxu1 %v6337_v4  ;;  %v6605_v4 = vld [vmem:[#allocation7] ss:$0 sm:$0xff] }
 0x211   : > { %5113 = vmatpush3.bf16.msra.mxu0 %v6339_v5  ;;  %5135 = vmatpush3.bf16.msra.mxu1 %v6341_v6 }
 0x212   : > { %5114 = vmatprep.subr.bf16.mxu0 %v6345_v7  ;;  %5136 = vmatprep.subr.bf16.mxu1 %v6349_v8 }
 0x215   : > { %5115 = vmatpush3.bf16.msra.mxu0 %v6351_v9  ;;  %5137 = vmatpush3.bf16.msra.mxu1 %v6353_v10 }
 0x216   : > { %5116 = vmatprep.subr.bf16.mxu0 %v6355_v11  ;;  %5138 = vmatprep.subr.bf16.mxu1 %v6357_v12 }
 0x219   : > { %5117 = vmatpush3.bf16.msra.mxu0 %v6363_v13  ;;  %5139 = vmatpush3.bf16.msra.mxu1 %v6365_v14 }
 0x21a   : > { %5118 = vmatprep.subr.bf16.mxu0 %v6367_v15  ;;  %5140 = vmatprep.subr.bf16.mxu1 %v6369_v16 }
 0x21d   : > { %5119 = vmatpush3.bf16.msra.mxu0 %v6375_v17  ;;  %5141 = vmatpush3.bf16.msra.mxu1 %v6377_v18 }
 0x21e   : > { %5120 = vmatprep.subr.bf16.mxu0 %v6379_v19  ;;  %5142 = vmatprep.subr.bf16.mxu1 %v6381_v20 }
 0x221   : > { %5121 = vmatpush3.bf16.msra.mxu0 %v6387_v21  ;;  %5143 = vmatpush3.bf16.msra.mxu1 %v6389_v22  ;;  %v1680_v21 = vld [vmem:[%s6130_s15 + $0x40] sm:$0xff] }
 0x222   : > { %5122 = vmatprep.subr.bf16.mxu0 %v6397_v23  ;;  %5144 = vmatprep.subr.bf16.mxu1 %v6399_v24  ;;  %v1684_v22 = vld [vmem:[%s6130_s15 + $0x60] sm:$0xff] }
 0x223   : > { %v4746_v47 = vcombine.high %v1680_v21, %v1684_v22  ;;  %v4745_v53 = vcombine.low %v1680_v21, %v1684_v22 }
 0x225   : > { %5123 = vmatpush3.bf16.msra.mxu0 %v6401_v25  ;;  %5145 = vmatpush3.bf16.msra.mxu1 %v6403_v26 }
 0x226   : > { %3229 = vmatprep.subr.bf16.mxu0 %v4738_v62  ;;  %3311 = vmatprep.subr.bf16.mxu1 %v4740_v1  ;;  %v1716_v62 = vld [vmem:[%s6130_s15 + $0x160] sm:$0xff]  ;;  %v4769_v1 = vcombine.low %v1704_v32, %v1708_v33  ;;  %v1765_v32 = vld [vmem:[%s6130_s15 + $0x2e8] sm:$0xff] }
 0x2a7   : > { %v5080_v2 = vpop.f32.mrb[4].mxu0  ;;  %v5102_v3 = vpop.f32.mrb[4].mxu1 }
 0x2a8   : > { %v5081_v5 = vpop.f32.mrb[5].mxu0  ;;  %v5103_v6 = vpop.f32.mrb[5].mxu1 }
 0x2a9   : > { %v5082_v7 = vadd.f32 %v5081_v5, %v5080_v2  ;;  %v5104_v8 = vadd.f32 %v5103_v6, %v5102_v3  ;;  %v5083_v9 = vpop.f32.mrb[6].mxu0  ;;  %v5105_v10 = vpop.f32.mrb[6].mxu1  ;;  %v4771_v2 = vcombine.low %v1705_v34, %v1709_v35  ;;  %v1720_v6 = vld [vmem:[%s6130_s15 + $0x180] sm:$0xff] }
 0x2aa   : > { %v5084_v11 = vpop.f32.mrb[7].mxu0  ;;  %v5106_v12 = vpop.f32.mrb[7].mxu1  ;;  %v1725_v9 = vld [vmem:[%s6130_s15 + $0x1a8] sm:$0xff] }
 0x2ab   : > { %v1126_v13 = vadd.f32 %v5082_v7, %v6605_v4  ;;  %v1724_v7 = vld [vmem:[%s6130_s15 + $0x1a0] sm:$0xff] }
 0x2ac   : > { %v4786_v12 = vcombine.high %v1720_v6, %v1724_v7 }
 0x2ad   : > { %v6608_v14 = vadd.f32 %v5104_v8, %v1126_v13  ;;  %v1721_v8 = vld [vmem:[%s6130_s15 + $0x188] sm:$0xff] }
 0x2ae   : > { %v4788_v13 = vcombine.high %v1721_v8, %v1725_v9 }
 0x2db   : > { %v1520_v15 = vpop.f32.mrb[8].mxu0  ;;  %v1561_v16 = vpop.f32.mrb[8].mxu1 }
 0x2dc   : > { %v1568_v17 = vmax.f32 %v1520_v15, 0.0  ;;  %v1570_v18 = vmax.f32 %v1561_v16, 0.0  ;;  %v1522_v19 = vpop.f32.mrb[9].mxu0  ;;  %v1563_v20 = vpop.f32.mrb[9].mxu1  ;;  %v1728_v15 = vld [vmem:[%s6130_s15 + $0x1c0] sm:$0xff] }
 0x2dd   : > { %v1569_v23 = vmax.f32 %v1522_v19, 0.0  ;;  %v1571_v24 = vmax.f32 %v1563_v20, 0.0  ;;  %v1524_v25 = vpop.f32.mrb[10].mxu0  ;;  %v1565_v26 = vpop.f32.mrb[10].mxu1  ;;  %v1732_v16 = vld [vmem:[%s6130_s15 + $0x1e0] sm:$0xff]  ;;  %v4785_v19 = vcombine.low %v1720_v6, %v1724_v7  ;;  %v4787_v20 = vcombine.low %v1721_v8, %v1725_v9  ;;  %v1781_v6 = vld [vmem:[%s6130_s15 + $0x368] sm:$0xff] }
 0x2de   : > { %v1574_v40 = vpack.c.bf16 %v1570_v18, %v1570_v18  ;;  %v1525_v42 = vpop.f32.mrb[11].mxu0  ;;  %v1566_v43 = vpop.f32.mrb[11].mxu1  ;;  %v1572_v46 = vpack.c.bf16 %v1568_v17, %v1568_v17  ;;  %v1729_v17 = vld [vmem:[%s6130_s15 + $0x1c8] sm:$0xff]  ;;  %v4794_v21 = vcombine.high %v1728_v15, %v1732_v16  ;;  %v4793_v37 = vcombine.low %v1728_v15, %v1732_v16 }
 0x2df   : > { %v1573_v44 = vpack.c.bf16 %v1569_v23, %v1569_v23  ;;  %v1575_v45 = vpack.c.bf16 %v1571_v24, %v1571_v24  ;;  %v1733_v18 = vld [vmem:[%s6130_s15 + $0x1e8] sm:$0xff]  ;;  %v1736_v23 = vld [vmem:[%s6130_s15 + $0x200] sm:$0xff] }
 0x2e0   : > { %v4796_v22 = vcombine.high %v1729_v17, %v1733_v18  ;;  %v1740_v24 = vld [vmem:[%s6130_s15 + $0x220] sm:$0xff]  ;;  %v1737_v25 = vld [vmem:[%s6130_s15 + $0x208] sm:$0xff]  ;;  %v4795_v38 = vcombine.low %v1729_v17, %v1733_v18 }
 0x2e1   : > { %1608 = vmatprep.mubr.bf16.mxu0 %v1573_v44  ;;  %1648 = vmatprep.mubr.bf16.mxu1 %v1575_v45  ;;  %v1741_v26 = vld [vmem:[%s6130_s15 + $0x228] sm:$0xff]  ;;  %v1744_v43 = vld [vmem:[%s6130_s15 + $0x240] sm:$0xff] }
 0x2e2   : > { %1609 = vmatmul.mubr.bf16.vlgmr.msra.gmra.mrb[12].mxu0 %v1572_v46  ;;  %1649 = vmatmul.mubr.bf16.vlgmr.msra.gmra.mrb[12].mxu1 %v1574_v40  ;;  %v4802_v40 = vcombine.high %v1736_v23, %v1740_v24  ;;  %v4804_v42 = vcombine.high %v1737_v25, %v1741_v26  ;;  %v1748_v44 = vld [vmem:[%s6130_s15 + $0x260] sm:$0xff]  ;;  %v1745_v45 = vld [vmem:[%s6130_s15 + $0x248] sm:$0xff] }
 0x2e3   : > { %3230 = vmatpush1.bf16.msra.mxu0 %v4737_v61  ;;  %3312 = vmatpush1.bf16.msra.mxu1 %v4739_v0  ;;  %v1712_v61 = vld [vmem:[%s6130_s15 + $0x140] sm:$0xff]  ;;  %v1717_v0 = vld [vmem:[%s6130_s15 + $0x168] sm:$0xff]  ;;  %v4810_v49 = vcombine.high %v1744_v43, %v1748_v44  ;;  %v4809_v51 = vcombine.low %v1744_v43, %v1748_v44 }
 0x2e4   : > { %3231 = vmatprep.subr.bf16.mxu0 %v4746_v47  ;;  %3313 = vmatprep.subr.bf16.mxu1 %v4748_v48  ;;  %v4778_v3 = vcombine.high %v1712_v61, %v1716_v62  ;;  %v4780_v5 = vcombine.high %v1713_v63, %v1717_v0  ;;  %v4777_v10 = vcombine.low %v1712_v61, %v1716_v62  ;;  %v1749_v46 = vld [vmem:[%s6130_s15 + $0x268] sm:$0xff] }
 0x2e5   : > { %v4779_v11 = vcombine.low %v1713_v63, %v1717_v0  ;;  %v4801_v47 = vcombine.low %v1736_v23, %v1740_v24  ;;  %v4803_v48 = vcombine.low %v1737_v25, %v1741_v26  ;;  %v4812_v50 = vcombine.high %v1745_v45, %v1749_v46  ;;  %v1773_v61 = vld [vmem:[%s6130_s15 + $0x328] sm:$0xff] }
 0x2e6   : > { %v4811_v52 = vcombine.low %v1745_v45, %v1749_v46  ;;  %v1789_v15 = vld [vmem:[%s6130_s15 + $0x3a8] sm:$0xff] }
 0x2e7   : > { %3232 = vmatpush1.bf16.msra.mxu0 %v4745_v53  ;;  %3314 = vmatpush1.bf16.msra.mxu1 %v4747_v54  ;;  %v1752_v53 = vld [vmem:[%s6130_s15 + $0x280] sm:$0xff]  ;;  %v1797_v23 = vld [vmem:[%s6130_s15 + $0x3e8] sm:$0xff] }
 0x2e8   : > { %3233 = vmatprep.subr.bf16.mxu0 %v4754_v55  ;;  %3315 = vmatprep.subr.bf16.mxu1 %v4756_v56  ;;  %v1756_v54 = vld [vmem:[%s6130_s15 + $0x2a0] sm:$0xff]  ;;  %v1753_v55 = vld [vmem:[%s6130_s15 + $0x288] sm:$0xff] }
 0x2e9   : > { %v4818_v56 = vcombine.high %v1752_v53, %v1756_v54  ;;  %v4817_v41 = vcombine.low %v1752_v53, %v1756_v54  ;;  %v4819_v59 = vcombine.low %v1753_v55, %v1757_v57  ;;  %v4820_v27 = vcombine.high %v1753_v55, %v1757_v57  ;;  %v1805_v43 = vld [vmem:[%s6130_s15 + $0x428] sm:$0xff] }
 0x2eb   : > { %3234 = vmatpush1.bf16.msra.mxu0 %v4753_v28  ;;  %3316 = vmatpush1.bf16.msra.mxu1 %v4755_v29  ;;  %v1760_v28 = vld [vmem:[%s6130_s15 + $0x2c0] sm:$0xff] }
 0x2ec   : > { %3235 = vmatprep.subr.bf16.mxu0 %v4762_v30  ;;  %3317 = vmatprep.subr.bf16.mxu1 %v4764_v31  ;;  %v1764_v29 = vld [vmem:[%s6130_s15 + $0x2e0] sm:$0xff]  ;;  %v1761_v30 = vld [vmem:[%s6130_s15 + $0x2c8] sm:$0xff] }
 0x2ed   : > { %v4826_v31 = vcombine.high %v1760_v28, %v1764_v29  ;;  %v4825_v33 = vcombine.low %v1760_v28, %v1764_v29  ;;  %v4827_v34 = vcombine.low %v1761_v30, %v1765_v32  ;;  %v4828_v35 = vcombine.high %v1761_v30, %v1765_v32 }
 0x2ee   : > { %v5830_v29 = vmov 1983009808  }
 0x2ef   : > { %3236 = vmatpush1.bf16.msra.mxu0 %v4761_v36  ;;  %3318 = vmatpush1.bf16.msra.mxu1 %v4763_v39  ;;  %v1768_v36 = vld [vmem:[%s6130_s15 + $0x300] sm:$0xff]  ;;  %v1930_v30 = vunpack.c.l.s4 %v5830_v29 }
 0x2f0   : > { %3237 = vmatprep.subr.bf16.mxu0 %v4770_v58  ;;  %3319 = vmatprep.subr.bf16.mxu1 %v4772_v60  ;;  %v1772_v39 = vld [vmem:[%s6130_s15 + $0x320] sm:$0xff]  ;;  %v1769_v58 = vld [vmem:[%s6130_s15 + $0x308] sm:$0xff] }
 0x2f1   : > { %v4834_v60 = vcombine.high %v1768_v36, %v1772_v39  ;;  %v4833_v62 = vcombine.low %v1768_v36, %v1772_v39  ;;  %v4835_v63 = vcombine.low %v1769_v58, %v1773_v61  ;;  %v4836_v0 = vcombine.high %v1769_v58, %v1773_v61  ;;  %v1856_v29 = vld [vmem:[%s6130_s15 + $0x5c0] sm:$0xff] }
 0x2f2   : > { %v1931_v36 = vunpack.c.0.s8 %v1930_v30  ;;  %v1860_v30 = vld [vmem:[%s6130_s15 + $0x5e0] sm:$0xff] }
 0x2f3   : > { %3238 = vmatpush1.bf16.msra.mxu0 %v4769_v1  ;;  %3320 = vmatpush1.bf16.msra.mxu1 %v4771_v2  ;;  %v1776_v1 = vld [vmem:[%s6130_s15 + $0x340] sm:$0xff] }
 0x2f4   : > { %3239 = vmatprep.subr.bf16.mxu0 %v4778_v3  ;;  %3321 = vmatprep.subr.bf16.mxu1 %v4780_v5  ;;  %v1780_v2 = vld [vmem:[%s6130_s15 + $0x360] sm:$0xff]  ;;  %v1777_v3 = vld [vmem:[%s6130_s15 + $0x348] sm:$0xff] }
 0x2f5   : > { %v4842_v5 = vcombine.high %v1776_v1, %v1780_v2  ;;  %v4841_v7 = vcombine.low %v1776_v1, %v1780_v2  ;;  %v4843_v8 = vcombine.low %v1777_v3, %v1781_v6  ;;  %v4844_v9 = vcombine.high %v1777_v3, %v1781_v6  ;;  %v1812_v1 = vld [vmem:[%s6130_s15 + $0x460] sm:$0xff]  ;;  %v1809_v2 = vld [vmem:[%s6130_s15 + $0x448] sm:$0xff] }
 0x2f6   : > { %v1813_v3 = vld [vmem:[%s6130_s15 + $0x468] sm:$0xff]  ;;  %v1816_v6 = vld [vmem:[%s6130_s15 + $0x480] sm:$0xff] }
 0x2f7   : > { %3240 = vmatpush1.bf16.msra.mxu0 %v4777_v10  ;;  %3322 = vmatpush1.bf16.msra.mxu1 %v4779_v11  ;;  %v1784_v10 = vld [vmem:[%s6130_s15 + $0x380] sm:$0xff] }
 0x2f8   : > { %3241 = vmatprep.subr.bf16.mxu0 %v4786_v12  ;;  %3323 = vmatprep.subr.bf16.mxu1 %v4788_v13  ;;  %v1788_v11 = vld [vmem:[%s6130_s15 + $0x3a0] sm:$0xff]  ;;  %v1785_v12 = vld [vmem:[%s6130_s15 + $0x388] sm:$0xff] }
 0x2f9   : > { %v4850_v13 = vcombine.high %v1784_v10, %v1788_v11  ;;  %v4849_v16 = vcombine.low %v1784_v10, %v1788_v11  ;;  %v4851_v17 = vcombine.low %v1785_v12, %v1789_v15  ;;  %v4852_v18 = vcombine.high %v1785_v12, %v1789_v15  ;;  %v1817_v10 = vld [vmem:[%s6130_s15 + $0x488] sm:$0xff] }
 0x2fa   : > { %v1821_v11 = vld [vmem:[%s6130_s15 + $0x4a8] sm:$0xff]  ;;  %v4875_v15 = vcombine.low %v1809_v2, %v1813_v3 }
 0x2fb   : > { %3242 = vmatpush1.bf16.msra.mxu0 %v4785_v19  ;;  %3324 = vmatpush1.bf16.msra.mxu1 %v4787_v20  ;;  %v1792_v19 = vld [vmem:[%s6130_s15 + $0x3c0] sm:$0xff] }
 0x2fc   : > { %3243 = vmatprep.subr.bf16.mxu0 %v4794_v21  ;;  %3325 = vmatprep.subr.bf16.mxu1 %v4796_v22  ;;  %v1796_v20 = vld [vmem:[%s6130_s15 + $0x3e0] sm:$0xff]  ;;  %v1793_v21 = vld [vmem:[%s6130_s15 + $0x3c8] sm:$0xff] }
 0x2fd   : > { %v4858_v22 = vcombine.high %v1792_v19, %v1796_v20  ;;  %v4857_v24 = vcombine.low %v1792_v19, %v1796_v20  ;;  %v4859_v25 = vcombine.low %v1793_v21, %v1797_v23  ;;  %v4860_v26 = vcombine.high %v1793_v21, %v1797_v23  ;;  %v1828_v19 = vld [vmem:[%s6130_s15 + $0x4e0] sm:$0xff]  ;;  %v1825_v20 = vld [vmem:[%s6130_s15 + $0x4c8] sm:$0xff] }
 0x2fe   : > { %v1829_v21 = vld [vmem:[%s6130_s15 + $0x4e8] sm:$0xff]  ;;  %v4883_v23 = vcombine.low %v1817_v10, %v1821_v11 }
 0x2ff   : > { %3244 = vmatpush1.bf16.msra.mxu0 %v4793_v37  ;;  %3326 = vmatpush1.bf16.msra.mxu1 %v4795_v38  ;;  %v1800_v37 = vld [vmem:[%s6130_s15 + $0x400] sm:$0xff] }
 0x300   : > { %3245 = vmatprep.subr.bf16.mxu0 %v4802_v40  ;;  %3327 = vmatprep.subr.bf16.mxu1 %v4804_v42  ;;  %v1804_v38 = vld [vmem:[%s6130_s15 + $0x420] sm:$0xff]  ;;  %v1801_v40 = vld [vmem:[%s6130_s15 + $0x408] sm:$0xff] }
 0x301   : > { %v4866_v42 = vcombine.high %v1800_v37, %v1804_v38  ;;  %v4865_v44 = vcombine.low %v1800_v37, %v1804_v38  ;;  %v4867_v45 = vcombine.low %v1801_v40, %v1805_v43  ;;  %v4868_v46 = vcombine.high %v1801_v40, %v1805_v43  ;;  %v1836_v37 = vld [vmem:[%s6130_s15 + $0x520] sm:$0xff]  ;;  %v1833_v38 = vld [vmem:[%s6130_s15 + $0x508] sm:$0xff] }
 0x302   : > { %v1837_v40 = vld [vmem:[%s6130_s15 + $0x528] sm:$0xff]  ;;  %v4891_v43 = vcombine.low %v1825_v20, %v1829_v21 }
 0x303   : > { %3246 = vmatpush1.bf16.msra.mxu0 %v4801_v47  ;;  %3328 = vmatpush1.bf16.msra.mxu1 %v4803_v48 }
 0x304   : > { %3247 = vmatprep.subr.bf16.mxu0 %v4810_v49  ;;  %3329 = vmatprep.subr.bf16.mxu1 %v4812_v50 }
 0x307   : > { %3248 = vmatpush1.bf16.msra.mxu0 %v4809_v51  ;;  %3330 = vmatpush1.bf16.msra.mxu1 %v4811_v52 }
 0x308   : > { %3249 = vmatprep.subr.bf16.mxu0 %v4818_v56  ;;  %3331 = vmatprep.subr.bf16.mxu1 %v4820_v27 }
 0x30b   : > { %3250 = vmatpush1.bf16.msra.mxu0 %v4817_v41  ;;  %3332 = vmatpush1.bf16.msra.mxu1 %v4819_v59  ;;  %v1171_v59 = vmax.f32 %v6608_v14, 0.0 }
 0x30c   : > { %3251 = vmatprep.subr.bf16.mxu0 %v4826_v31  ;;  %3333 = vmatprep.subr.bf16.mxu1 %v4828_v35  ;;  %v1932_v31 = vlaneseq }
 0x30d   : > { %v1172_v32 = vpack.c.bf16 %v1171_v59, %v1171_v59 }
 0x30f   : > { %3252 = vmatpush1.bf16.msra.mxu0 %v4825_v33  ;;  %3334 = vmatpush1.bf16.msra.mxu1 %v4827_v34 }
 0x310   : > { %3253 = vmatprep.subr.bf16.mxu0 %v4834_v60  ;;  %3335 = vmatprep.subr.bf16.mxu1 %v4836_v0 }
 0x313   : > { %3254 = vmatpush1.bf16.msra.mxu0 %v4833_v62  ;;  %3336 = vmatpush1.bf16.msra.mxu1 %v4835_v63  ;;  %v1808_v63 = vld [vmem:[%s6130_s15 + $0x440] sm:$0xff] }
 0x314   : > { %3255 = vmatprep.subr.bf16.mxu0 %v4842_v5  ;;  %3337 = vmatprep.subr.bf16.mxu1 %v4844_v9  ;;  %v1820_v9 = vld [vmem:[%s6130_s15 + $0x4a0] sm:$0xff] }
 0x317   : > { %3256 = vmatpush1.bf16.msra.mxu0 %v4841_v7  ;;  %3338 = vmatpush1.bf16.msra.mxu1 %v4843_v8  ;;  %v4874_v7 = vcombine.high %v1808_v63, %v1812_v1  ;;  %v4876_v8 = vcombine.high %v1809_v2, %v1813_v3 }
 0x318   : > { %3257 = vmatprep.subr.bf16.mxu0 %v4850_v13  ;;  %3339 = vmatprep.subr.bf16.mxu1 %v4852_v18  ;;  %v4873_v13 = vcombine.low %v1808_v63, %v1812_v1  ;;  %v1824_v18 = vld [vmem:[%s6130_s15 + $0x4c0] sm:$0xff]  ;;  %v4921_v63 = vcombine.low %v1856_v29, %v1860_v30 }
 0x31b   : > { %3258 = vmatpush1.bf16.msra.mxu0 %v4849_v16  ;;  %3340 = vmatpush1.bf16.msra.mxu1 %v4851_v17  ;;  %v4882_v16 = vcombine.high %v1816_v6, %v1820_v9  ;;  %v4884_v17 = vcombine.high %v1817_v10, %v1821_v11 }
 0x31c   : > { %3259 = vmatprep.subr.bf16.mxu0 %v4858_v22  ;;  %3341 = vmatprep.subr.bf16.mxu1 %v4860_v26  ;;  %v4881_v22 = vcombine.low %v1816_v6, %v1820_v9  ;;  %v1832_v26 = vld [vmem:[%s6130_s15 + $0x500] sm:$0xff]  ;;  %v1877_v9 = vld [vmem:[%s6130_s15 + $0x668] sm:$0xff] }
 0x31d   : > { %v1872_v6 = vld [vmem:[%s6130_s15 + $0x640] sm:$0xff] }
 0x31f   : > { %3260 = vmatpush1.bf16.msra.mxu0 %v4857_v24  ;;  %3342 = vmatpush1.bf16.msra.mxu1 %v4859_v25  ;;  %v4890_v24 = vcombine.high %v1824_v18, %v1828_v19  ;;  %v4892_v25 = vcombine.high %v1825_v20, %v1829_v21 }
 0x320   : > { %3270 = vmatprep.subr.bf16.mxu0 %v4866_v42  ;;  %3352 = vmatprep.subr.bf16.mxu1 %v4868_v46  ;;  %v4889_v42 = vcombine.low %v1824_v18, %v1828_v19  ;;  %v1840_v46 = vld [vmem:[%s6130_s15 + $0x540] sm:$0xff]  ;;  %v1881_v18 = vld [vmem:[%s6130_s15 + $0x688] sm:$0xff] }
 0x321   : > { %v1885_v19 = vld [vmem:[%s6130_s15 + $0x6a8] sm:$0xff] }
 0x3b5   : > { %v5124_v47 = vpop.f32.mrb[12].mxu0  ;;  %v5146_v48 = vpop.f32.mrb[12].mxu1 }
 0x3b6   : > { %v5125_v49 = vpop.f32.mrb[13].mxu0  ;;  %v5147_v50 = vpop.f32.mrb[13].mxu1 }
 0x3b7   : > { %v5126_v51 = vadd.f32 %v5125_v49, %v5124_v47  ;;  %v5148_v52 = vadd.f32 %v5147_v50, %v5146_v48  ;;  %v5127_v53 = vpop.f32.mrb[14].mxu0  ;;  %v5149_v54 = vpop.f32.mrb[14].mxu1  ;;  %v1844_v47 = vld [vmem:[%s6130_s15 + $0x560] sm:$0xff]  ;;  %v1841_v48 = vld [vmem:[%s6130_s15 + $0x548] sm:$0xff]  ;;  %v4897_v50 = vcombine.low %v1832_v26, %v1836_v37 }
 0x3b8   : > { %v5128_v55 = vpop.f32.mrb[15].mxu0  ;;  %v5150_v56 = vpop.f32.mrb[15].mxu1  ;;  %v1845_v49 = vld [vmem:[%s6130_s15 + $0x568] sm:$0xff]  ;;  %v1848_v54 = vld [vmem:[%s6130_s15 + $0x580] sm:$0xff] }
 0x3b9   : > { %v1611_v57 = vadd.f32 %v5126_v51, %v6605_v4  ;;  %v6677_v4 = vshrl.u32 %v1932_v31, 7  ;;  %v4899_v51 = vcombine.low %v1833_v38, %v1837_v40  ;;  %v4908_v53 = vcombine.high %v1841_v48, %v1845_v49  ;;  %v1852_v55 = vld [vmem:[%s6130_s15 + $0x5a0] sm:$0xff]  ;;  %v1849_v56 = vld [vmem:[%s6130_s15 + $0x588] sm:$0xff] }
 0x3ba   : > { %v4907_v59 = vcombine.low %v1841_v48, %v1845_v49  ;;  %v1857_v31 = vld [vmem:[%s6130_s15 + $0x5c8] sm:$0xff] }
 0x3bb   : > { %v1651_v41 = vadd.f32 %v5148_v52, %v1611_v57  ;;  %v6680_v58 = vsub.s32 %v1931_v36, %v6677_v4  ;;  %v4906_v52 = vcombine.high %v1840_v46, %v1844_v47  ;;  %v1853_v57 = vld [vmem:[%s6130_s15 + $0x5a8] sm:$0xff] }
 0x3bd   : > { %v1656_v27 = vmax.f32 %v1651_v41, 0.0  ;;  %v4905_v41 = vcombine.low %v1840_v46, %v1844_v47  ;;  %v1897_v46 = vld [vmem:[%s6130_s15 + $0x708] sm:$0xff] }
 0x3be   : > { %v1901_v47 = vld [vmem:[%s6130_s15 + $0x728] sm:$0xff] }
 0x3bf   : > { %v1657_v28 = vpack.c.bf16 %v1656_v27, %v1656_v27  ;;  %v4914_v27 = vcombine.high %v1848_v54, %v1852_v55 }
 0x3c1   : > { %v1659_v33 = vrot.slane %v1657_v28, 6  ;;  %v4916_v28 = vcombine.high %v1849_v56, %v1853_v57 }
 0x3c3   : > { %v1662_v34 = vsel %vm790_vm1, %v1172_v32, %v1659_v33  ;;  %v1861_v32 = vld [vmem:[%s6130_s15 + $0x5e8] sm:$0xff]  ;;  %v4913_v33 = vcombine.low %v1848_v54, %v1852_v55 }
 0x3c4   : > { %v1665_v35 = vunpack.i.h.s16 %v1662_v34  ;;  %v4924_v36 = vcombine.high %v1857_v31, %v1861_v32  ;;  %v4923_v1 = vcombine.low %v1857_v31, %v1861_v32  ;;  %v1905_v54 = vld [vmem:[%s6130_s15 + $0x748] sm:$0xff] }
 0x3c5   : > { %v1909_v55 = vld [vmem:[%s6130_s15 + $0x768] sm:$0xff] }
 0x3c6   : > { %v4734_v39 = vpack.c.b16 %v1665_v35, %v1662_v34  ;;  %v4915_v34 = vcombine.low %v1849_v56, %v1853_v57  ;;  %v4922_v35 = vcombine.high %v1856_v29, %v1860_v30  ;;  %v4963_v57 = vcombine.low %v1897_v46, %v1901_v47  ;;  %v1913_v29 = vld [vmem:[%s6130_s15 + $0x788] sm:$0xff] }
 0x3c7   : > { %v1917_v30 = vld [vmem:[%s6130_s15 + $0x7a8] sm:$0xff]  ;;  %v4971_v32 = vcombine.low %v1905_v54, %v1909_v55 }
 0x3c8   : > { %v1668_v14 = vunpack.i.h.s16 %v4734_v39 }
 0x3ca   : > { %v4735_v60 = vpack.c.b16 %v1668_v14, %v4734_v39  ;;  %v4736_v61 = vpack.c.b16 %v1668_v14, %v1668_v14  ;;  %v1864_v39 = vld [vmem:[%s6130_s15 + $0x600] sm:$0xff] }
 0x3cb   : > { %v1868_v14 = vld [vmem:[%s6130_s15 + $0x620] sm:$0xff] }
 0x3cc   : > { %v6683_v62 = vrot.slane %v4735_v60, %v6680_v58  ;;  %v6687_v0 = vrot.slane %v4736_v61, %v6680_v58  ;;  %v1865_v60 = vld [vmem:[%s6130_s15 + $0x608] sm:$0xff]  ;;  %v4930_v2 = vcombine.high %v1864_v39, %v1868_v14  ;;  %v4929_v10 = vcombine.low %v1864_v39, %v1868_v14 }
 0x3cd   : > { %v1869_v61 = vld [vmem:[%s6130_s15 + $0x628] sm:$0xff] }
 0x3ce   : > { %v6694_v5 = vcombine.high %v6683_v62, %v6683_v62  ;;  %v6706_v12 = vcombine.high %v6687_v0, %v6687_v0  ;;  %v4932_v3 = vcombine.high %v1865_v60, %v1869_v61  ;;  %v4931_v11 = vcombine.low %v1865_v60, %v1869_v61  ;;  %v1921_v39 = vld [vmem:[%s6130_s15 + $0x7c8] sm:$0xff] }
 0x3cf   : > { %v1925_v14 = vld [vmem:[%s6130_s15 + $0x7e8] sm:$0xff]  ;;  %v4979_v61 = vcombine.low %v1913_v29, %v1917_v30 }
 0x3d0   : > { %3261 = vmatprep.mubr.bf16.mxu0 %v6694_v5  ;;  %3343 = vmatprep.mubr.bf16.mxu1 %v6694_v5 }
 0x3d1   : > { %3262 = vmatmul.mubr.bf16.vlgmr.msra.gmra.mrb[16].mxu0 %v6683_v62  ;;  %3344 = vmatmul.mubr.bf16.vlgmr.msra.gmra.mrb[16].mxu1 %v6683_v62 }
 0x3d2   : > { %3271 = vmatpush1.bf16.msra.mxu0 %v4865_v44  ;;  %3353 = vmatpush1.bf16.msra.mxu1 %v4867_v45  ;;  %v4898_v44 = vcombine.high %v1832_v26, %v1836_v37  ;;  %v4900_v45 = vcombine.high %v1833_v38, %v1837_v40  ;;  %v1889_v26 = vld [vmem:[%s6130_s15 + $0x6c8] sm:$0xff]  ;;  %v4947_v40 = vcombine.low %v1881_v18, %v1885_v19 }
 0x3d3   : > { %3302 = vmatprep.mubr.bf16.mxu0 %v6706_v12  ;;  %3384 = vmatprep.mubr.bf16.mxu1 %v6706_v12  ;;  %v1893_v37 = vld [vmem:[%s6130_s15 + $0x6e8] sm:$0xff] }
 0x3d4   : > { %3272 = vmatprep.subr.bf16.mxu0 %v4874_v7  ;;  %3354 = vmatprep.subr.bf16.mxu1 %v4876_v8  ;;  %v1876_v7 = vld [vmem:[%s6130_s15 + $0x660] sm:$0xff]  ;;  %v1873_v8 = vld [vmem:[%s6130_s15 + $0x648] sm:$0xff]  ;;  %v4955_v49 = vcombine.low %v1889_v26, %v1893_v37 }
 0x3d5   : > { %v4937_v20 = vcombine.low %v1872_v6, %v1876_v7  ;;  %v4939_v21 = vcombine.low %v1873_v8, %v1877_v9 }
 0x3d6   : > { %3273 = vmatpush1.bf16.msra.mxu0 %v4873_v13  ;;  %3355 = vmatpush1.bf16.msra.mxu1 %v4875_v15  ;;  %v4938_v13 = vcombine.high %v1872_v6, %v1876_v7  ;;  %v4940_v15 = vcombine.high %v1873_v8, %v1877_v9  ;;  %v1675_v6 = vld [vmem:[%s6130_s15 + $0x18] sm:$0xff]  ;;  %v4987_v9 = vcombine.low %v1921_v39, %v1925_v14 }
 0x3d7   : > { %3274 = vmatprep.subr.bf16.mxu0 %v4882_v16  ;;  %3356 = vmatprep.subr.bf16.mxu1 %v4884_v17  ;;  %v1880_v16 = vld [vmem:[%s6130_s15 + $0x680] sm:$0xff]  ;;  %v1679_v7 = vld [vmem:[%s6130_s15 + $0x38] sm:$0xff] }
 0x3d8   : > { %v1884_v17 = vld [vmem:[%s6130_s15 + $0x6a0] sm:$0xff] }
 0x3d9   : > { %v4945_v38 = vcombine.low %v1880_v16, %v1884_v17 }
 0x3da   : > { %3275 = vmatpush1.bf16.msra.mxu0 %v4881_v22  ;;  %3357 = vmatpush1.bf16.msra.mxu1 %v4883_v23  ;;  %v4946_v22 = vcombine.high %v1880_v16, %v1884_v17  ;;  %v4948_v23 = vcombine.high %v1881_v18, %v1885_v19  ;;  %v1683_v16 = vld [vmem:[%s6130_s15 + $0x58] sm:$0xff]  ;;  %v4743_v19 = vcombine.low %v1675_v6, %v1679_v7 }
 0x3db   : > { %3276 = vmatprep.subr.bf16.mxu0 %v4890_v24  ;;  %3358 = vmatprep.subr.bf16.mxu1 %v4892_v25  ;;  %v1888_v24 = vld [vmem:[%s6130_s15 + $0x6c0] sm:$0xff]  ;;  %v1687_v17 = vld [vmem:[%s6130_s15 + $0x78] sm:$0xff] }
 0x3dc   : > { %v1892_v25 = vld [vmem:[%s6130_s15 + $0x6e0] sm:$0xff] }
 0x3dd   : > { %v4953_v48 = vcombine.low %v1888_v24, %v1892_v25 }
 0x3de   : > { %3277 = vmatpush1.bf16.msra.mxu0 %v4889_v42  ;;  %3359 = vmatpush1.bf16.msra.mxu1 %v4891_v43  ;;  %v4954_v42 = vcombine.high %v1888_v24, %v1892_v25  ;;  %v4956_v43 = vcombine.high %v1889_v26, %v1893_v37  ;;  %v1691_v24 = vld [vmem:[%s6130_s15 + $0x98] sm:$0xff]  ;;  %v4751_v37 = vcombine.low %v1683_v16, %v1687_v17 }
 0x3df   : > { %3278 = vmatprep.subr.bf16.mxu0 %v4898_v44  ;;  %3360 = vmatprep.subr.bf16.mxu1 %v4900_v45  ;;  %v1896_v44 = vld [vmem:[%s6130_s15 + $0x700] sm:$0xff]  ;;  %v1695_v25 = vld [vmem:[%s6130_s15 + $0xb8] sm:$0xff] }
 0x3e0   : > { %v1900_v45 = vld [vmem:[%s6130_s15 + $0x720] sm:$0xff] }
 0x3e1   : > { %v4961_v56 = vcombine.low %v1896_v44, %v1900_v45 }
 0x3e2   : > { %3279 = vmatpush1.bf16.msra.mxu0 %v4897_v50  ;;  %3361 = vmatpush1.bf16.msra.mxu1 %v4899_v51  ;;  %v4962_v50 = vcombine.high %v1896_v44, %v1900_v45  ;;  %v4964_v51 = vcombine.high %v1897_v46, %v1901_v47  ;;  %v1699_v44 = vld [vmem:[%s6130_s15 + $0xd8] sm:$0xff]  ;;  %v4759_v47 = vcombine.low %v1691_v24, %v1695_v25 }
 0x3e3   : > { %3280 = vmatprep.subr.bf16.mxu0 %v4906_v52  ;;  %3362 = vmatprep.subr.bf16.mxu1 %v4908_v53  ;;  %v1904_v52 = vld [vmem:[%s6130_s15 + $0x740] sm:$0xff]  ;;  %v1703_v45 = vld [vmem:[%s6130_s15 + $0xf8] sm:$0xff] }
 0x3e4   : > { %v1908_v53 = vld [vmem:[%s6130_s15 + $0x760] sm:$0xff] }
 0x3e5   : > { %v4969_v31 = vcombine.low %v1904_v52, %v1908_v53 }
 0x3e6   : > { %3281 = vmatpush1.bf16.msra.mxu0 %v4905_v41  ;;  %3363 = vmatpush1.bf16.msra.mxu1 %v4907_v59  ;;  %v4970_v41 = vcombine.high %v1904_v52, %v1908_v53  ;;  %v4972_v59 = vcombine.high %v1905_v54, %v1909_v55  ;;  %v1711_v52 = vld [vmem:[%s6130_s15 + $0x138] sm:$0xff]  ;;  %v4767_v54 = vcombine.low %v1699_v44, %v1703_v45 }
 0x3e7   : > { %3282 = vmatprep.subr.bf16.mxu0 %v4914_v27  ;;  %3364 = vmatprep.subr.bf16.mxu1 %v4916_v28  ;;  %v1912_v27 = vld [vmem:[%s6130_s15 + $0x780] sm:$0xff] }
 0x3e8   : > { %v1916_v28 = vld [vmem:[%s6130_s15 + $0x7a0] sm:$0xff] }
 0x3e9   : > { %v4977_v60 = vcombine.low %v1912_v27, %v1916_v28 }
 0x3ea   : > { %3283 = vmatpush1.bf16.msra.mxu0 %v4913_v33  ;;  %3365 = vmatpush1.bf16.msra.mxu1 %v4915_v34  ;;  %v4978_v33 = vcombine.high %v1912_v27, %v1916_v28  ;;  %v4980_v34 = vcombine.high %v1913_v29, %v1917_v30  ;;  %v1719_v27 = vld [vmem:[%s6130_s15 + $0x178] sm:$0xff] }
 0x3eb   : > { %3284 = vmatprep.subr.bf16.mxu0 %v4922_v35  ;;  %3366 = vmatprep.subr.bf16.mxu1 %v4924_v36  ;;  %v1920_v35 = vld [vmem:[%s6130_s15 + $0x7c0] sm:$0xff] }
 0x3ec   : > { %v1924_v36 = vld [vmem:[%s6130_s15 + $0x7e0] sm:$0xff] }
 0x3ed   : > { %v4985_v8 = vcombine.low %v1920_v35, %v1924_v36 }
 0x3ee   : > { %3285 = vmatpush1.bf16.msra.mxu0 %v4921_v63  ;;  %3367 = vmatpush1.bf16.msra.mxu1 %v4923_v1  ;;  %v4986_v63 = vcombine.high %v1920_v35, %v1924_v36  ;;  %v4988_v1 = vcombine.high %v1921_v39, %v1925_v14  ;;  %v1727_v35 = vld [vmem:[%s6130_s15 + $0x1b8] sm:$0xff] }
 0x3ef   : > { %3286 = vmatprep.subr.bf16.mxu0 %v4930_v2  ;;  %3368 = vmatprep.subr.bf16.mxu1 %v4932_v3  ;;  %v1674_v2 = vld [vmem:[%s6130_s15 + $0x10] sm:$0xff] }
 0x3f0   : > { %v1678_v3 = vld [vmem:[%s6130_s15 + $0x30] sm:$0xff] }
 0x3f1   : > { %v4741_v18 = vcombine.low %v1674_v2, %v1678_v3 }
 0x3f2   : > { %3287 = vmatpush1.bf16.msra.mxu0 %v4929_v10  ;;  %3369 = vmatpush1.bf16.msra.mxu1 %v4931_v11  ;;  %v4742_v10 = vcombine.high %v1674_v2, %v1678_v3  ;;  %v4744_v11 = vcombine.high %v1675_v6, %v1679_v7  ;;  %v1735_v2 = vld [vmem:[%s6130_s15 + $0x1f8] sm:$0xff] }
 0x3f3   : > { %3288 = vmatprep.subr.bf16.mxu0 %v4938_v13  ;;  %3370 = vmatprep.subr.bf16.mxu1 %v4940_v15  ;;  %v1682_v13 = vld [vmem:[%s6130_s15 + $0x50] sm:$0xff] }
 0x3f4   : > { %v1686_v15 = vld [vmem:[%s6130_s15 + $0x70] sm:$0xff] }
 0x3f5   : > { %v4749_v26 = vcombine.low %v1682_v13, %v1686_v15 }
 0x3f6   : > { %3289 = vmatpush1.bf16.msra.mxu0 %v4937_v20  ;;  %3371 = vmatpush1.bf16.msra.mxu1 %v4939_v21  ;;  %v4750_v20 = vcombine.high %v1682_v13, %v1686_v15  ;;  %v4752_v21 = vcombine.high %v1683_v16, %v1687_v17  ;;  %v1743_v13 = vld [vmem:[%s6130_s15 + $0x238] sm:$0xff] }
 0x3f7   : > { %3290 = vmatprep.subr.bf16.mxu0 %v4946_v22  ;;  %3372 = vmatprep.subr.bf16.mxu1 %v4948_v23  ;;  %v1690_v22 = vld [vmem:[%s6130_s15 + $0x90] sm:$0xff] }
 0x3f8   : > { %v1694_v23 = vld [vmem:[%s6130_s15 + $0xb0] sm:$0xff] }
 0x3f9   : > { %v4757_v46 = vcombine.low %v1690_v22, %v1694_v23 }
 0x3fa   : > { %3291 = vmatpush1.bf16.msra.mxu0 %v4945_v38  ;;  %3373 = vmatpush1.bf16.msra.mxu1 %v4947_v40  ;;  %v4758_v38 = vcombine.high %v1690_v22, %v1694_v23  ;;  %v4760_v40 = vcombine.high %v1691_v24, %v1695_v25  ;;  %v1751_v22 = vld [vmem:[%s6130_s15 + $0x278] sm:$0xff] }
 0x3fb   : > { %3292 = vmatprep.subr.bf16.mxu0 %v4954_v42  ;;  %3374 = vmatprep.subr.bf16.mxu1 %v4956_v43  ;;  %v1698_v42 = vld [vmem:[%s6130_s15 + $0xd0] sm:$0xff] }
 0x3fc   : > { %v1702_v43 = vld [vmem:[%s6130_s15 + $0xf0] sm:$0xff] }
 0x3fd   : > { %v4765_v53 = vcombine.low %v1698_v42, %v1702_v43 }
 0x3fe   : > { %3293 = vmatpush1.bf16.msra.mxu0 %v4953_v48  ;;  %3375 = vmatpush1.bf16.msra.mxu1 %v4955_v49  ;;  %v4768_v48 = vcombine.high %v1699_v44, %v1703_v45  ;;  %v1706_v49 = vld [vmem:[%s6130_s15 + $0x110] sm:$0xff] }
 0x3ff   : > { %3294 = vmatprep.subr.bf16.mxu0 %v4962_v50  ;;  %3376 = vmatprep.subr.bf16.mxu1 %v4964_v51  ;;  %v1710_v50 = vld [vmem:[%s6130_s15 + $0x130] sm:$0xff]  ;;  %v1707_v51 = vld [vmem:[%s6130_s15 + $0x118] sm:$0xff] }
 0x400   : > { %v4774_v55 = vcombine.high %v1706_v49, %v1710_v50  ;;  %v4773_v28 = vcombine.low %v1706_v49, %v1710_v50  ;;  %v4775_v29 = vcombine.low %v1707_v51, %v1711_v52  ;;  %v1767_v49 = vld [vmem:[%s6130_s15 + $0x2f8] sm:$0xff] }
 0x402   : > { %3295 = vmatpush1.bf16.msra.mxu0 %v4961_v56  ;;  %3377 = vmatpush1.bf16.msra.mxu1 %v4963_v57  ;;  %v4776_v56 = vcombine.high %v1707_v51, %v1711_v52  ;;  %v1714_v57 = vld [vmem:[%s6130_s15 + $0x150] sm:$0xff] }
 0x403   : > { %3296 = vmatprep.subr.bf16.mxu0 %v4970_v41  ;;  %3378 = vmatprep.subr.bf16.mxu1 %v4972_v59  ;;  %v1718_v41 = vld [vmem:[%s6130_s15 + $0x170] sm:$0xff]  ;;  %v1715_v59 = vld [vmem:[%s6130_s15 + $0x158] sm:$0xff] }
 0x404   : > { %v4782_v30 = vcombine.high %v1714_v57, %v1718_v41  ;;  %v4781_v36 = vcombine.low %v1714_v57, %v1718_v41  ;;  %v4783_v39 = vcombine.low %v1715_v59, %v1719_v27  ;;  %v1775_v57 = vld [vmem:[%s6130_s15 + $0x338] sm:$0xff] }
 0x406   : > { %3297 = vmatpush1.bf16.msra.mxu0 %v4969_v31  ;;  %3379 = vmatpush1.bf16.msra.mxu1 %v4971_v32  ;;  %v4784_v31 = vcombine.high %v1715_v59, %v1719_v27  ;;  %v1722_v32 = vld [vmem:[%s6130_s15 + $0x190] sm:$0xff] }
 0x407   : > { %3298 = vmatprep.subr.bf16.mxu0 %v4978_v33  ;;  %3380 = vmatprep.subr.bf16.mxu1 %v4980_v34  ;;  %v1726_v33 = vld [vmem:[%s6130_s15 + $0x1b0] sm:$0xff]  ;;  %v1723_v34 = vld [vmem:[%s6130_s15 + $0x198] sm:$0xff] }
 0x408   : > { %v4790_v14 = vcombine.high %v1722_v32, %v1726_v33  ;;  %v4789_v3 = vcombine.low %v1722_v32, %v1726_v33  ;;  %v4791_v6 = vcombine.low %v1723_v34, %v1727_v35  ;;  %v1783_v32 = vld [vmem:[%s6130_s15 + $0x378] sm:$0xff] }
 0x40a   : > { %3299 = vmatpush1.bf16.msra.mxu0 %v4977_v60  ;;  %3381 = vmatpush1.bf16.msra.mxu1 %v4979_v61  ;;  %v4792_v60 = vcombine.high %v1723_v34, %v1727_v35  ;;  %v1730_v61 = vld [vmem:[%s6130_s15 + $0x1d0] sm:$0xff] }
 0x40b   : > { %3300 = vmatprep.subr.bf16.mxu0 %v4986_v63  ;;  %3382 = vmatprep.subr.bf16.mxu1 %v4988_v1  ;;  %v1734_v63 = vld [vmem:[%s6130_s15 + $0x1f0] sm:$0xff]  ;;  %v1731_v1 = vld [vmem:[%s6130_s15 + $0x1d8] sm:$0xff] }
 0x40c   : > { %v4798_v7 = vcombine.high %v1730_v61, %v1734_v63  ;;  %v4797_v15 = vcombine.low %v1730_v61, %v1734_v63  ;;  %v4799_v16 = vcombine.low %v1731_v1, %v1735_v2  ;;  %v1791_v61 = vld [vmem:[%s6130_s15 + $0x3b8] sm:$0xff] }
 0x40e   : > { %3301 = vmatpush1.bf16.msra.mxu0 %v4985_v8  ;;  %3383 = vmatpush1.bf16.msra.mxu1 %v4987_v9  ;;  %v4800_v8 = vcombine.high %v1731_v1, %v1735_v2  ;;  %v1738_v9 = vld [vmem:[%s6130_s15 + $0x210] sm:$0xff] }
 0x40f   : > { %3393 = vmatprep.subr.bf16.mxu0 %v4742_v10  ;;  %3475 = vmatprep.subr.bf16.mxu1 %v4744_v11  ;;  %v1742_v10 = vld [vmem:[%s6130_s15 + $0x230] sm:$0xff]  ;;  %v1739_v11 = vld [vmem:[%s6130_s15 + $0x218] sm:$0xff] }
 0x410   : > { %v4806_v17 = vcombine.high %v1738_v9, %v1742_v10  ;;  %v4805_v23 = vcombine.low %v1738_v9, %v1742_v10  ;;  %v4807_v24 = vcombine.low %v1739_v11, %v1743_v13  ;;  %v1799_v9 = vld [vmem:[%s6130_s15 + $0x3f8] sm:$0xff] }
 0x411   : > { %3303 = vmatmul.mubr.bf16.vlgmr.msra.gmra.mrb[16].mxu0 %v6687_v0  ;;  %3385 = vmatmul.mubr.bf16.vlgmr.msra.gmra.mrb[16].mxu1 %v6687_v0 }
 0x412   : > { %3394 = vmatpush1.bf16.msra.mxu0 %v4741_v18  ;;  %3425 = vmatprep.mubr.bf16.mxu0 %v6694_v5  ;;  %v4808_v18 = vcombine.high %v1739_v11, %v1743_v13 }
 0x413   : > { %3476 = vmatpush1.bf16.msra.mxu1 %v4743_v19  ;;  %3507 = vmatprep.mubr.bf16.mxu1 %v6694_v5  ;;  %v4766_v5 = vcombine.high %v1698_v42, %v1702_v43  ;;  %v1746_v19 = vld [vmem:[%s6130_s15 + $0x250] sm:$0xff]  ;;  %v1759_v42 = vld [vmem:[%s6130_s15 + $0x2b8] sm:$0xff] }
 0x414   : > { %3395 = vmatprep.subr.bf16.mxu0 %v4750_v20  ;;  %3477 = vmatprep.subr.bf16.mxu1 %v4752_v21  ;;  %v1750_v20 = vld [vmem:[%s6130_s15 + $0x270] sm:$0xff]  ;;  %v1747_v21 = vld [vmem:[%s6130_s15 + $0x258] sm:$0xff] }
 0x415   : > { %v4814_v25 = vcombine.high %v1746_v19, %v1750_v20  ;;  %v4813_v43 = vcombine.low %v1746_v19, %v1750_v20  ;;  %v4815_v44 = vcombine.low %v1747_v21, %v1751_v22  ;;  %v1807_v19 = vld [vmem:[%s6130_s15 + $0x438] sm:$0xff] }
 0x416   : > { %3396 = vmatpush1.bf16.msra.mxu0 %v4749_v26  ;;  %v4816_v26 = vcombine.high %v1747_v21, %v1751_v22 }
 0x417   : > { %3478 = vmatpush1.bf16.msra.mxu1 %v4751_v37  ;;  %3397 = vmatprep.subr.bf16.mxu0 %v4758_v38  ;;  %v1754_v37 = vld [vmem:[%s6130_s15 + $0x290] sm:$0xff] }
 0x418   : > { %3479 = vmatprep.subr.bf16.mxu1 %v4760_v40  ;;  %v1758_v38 = vld [vmem:[%s6130_s15 + $0x2b0] sm:$0xff]  ;;  %v1755_v40 = vld [vmem:[%s6130_s15 + $0x298] sm:$0xff] }
 0x419   : > { %v4822_v45 = vcombine.high %v1754_v37, %v1758_v38  ;;  %v4821_v50 = vcombine.low %v1754_v37, %v1758_v38  ;;  %v4823_v51 = vcombine.low %v1755_v40, %v1759_v42  ;;  %v1811_v37 = vld [vmem:[%s6130_s15 + $0x458] sm:$0xff] }
 0x41a   : > { %3398 = vmatpush1.bf16.msra.mxu0 %v4757_v46  ;;  %v4824_v46 = vcombine.high %v1755_v40, %v1759_v42  ;;  %v1815_v38 = vld [vmem:[%s6130_s15 + $0x478] sm:$0xff] }
 0x41b   : > { %3480 = vmatpush1.bf16.msra.mxu1 %v4759_v47  ;;  %3399 = vmatprep.subr.bf16.mxu0 %v4766_v5  ;;  %v1762_v47 = vld [vmem:[%s6130_s15 + $0x2d0] sm:$0xff] }
 0x41c   : > { %3481 = vmatprep.subr.bf16.mxu1 %v4768_v48  ;;  %v1766_v5 = vld [vmem:[%s6130_s15 + $0x2f0] sm:$0xff]  ;;  %v1763_v48 = vld [vmem:[%s6130_s15 + $0x2d8] sm:$0xff] }
 0x41d   : > { %v4830_v52 = vcombine.high %v1762_v47, %v1766_v5  ;;  %v4829_v41 = vcombine.low %v1762_v47, %v1766_v5  ;;  %v4831_v59 = vcombine.low %v1763_v48, %v1767_v49  ;;  %v1823_v47 = vld [vmem:[%s6130_s15 + $0x4b8] sm:$0xff] }
 0x41e   : > { %3400 = vmatpush1.bf16.msra.mxu0 %v4765_v53  ;;  %v4832_v53 = vcombine.high %v1763_v48, %v1767_v49  ;;  %v4879_v48 = vcombine.low %v1811_v37, %v1815_v38 }
 0x41f   : > { %3482 = vmatpush1.bf16.msra.mxu1 %v4767_v54  ;;  %3401 = vmatprep.subr.bf16.mxu0 %v4774_v55  ;;  %v1770_v54 = vld [vmem:[%s6130_s15 + $0x310] sm:$0xff] }
 0x420   : > { %3483 = vmatprep.subr.bf16.mxu1 %v4776_v56  ;;  %v1774_v55 = vld [vmem:[%s6130_s15 + $0x330] sm:$0xff]  ;;  %v1771_v56 = vld [vmem:[%s6130_s15 + $0x318] sm:$0xff] }
 0x421   : > { %v4838_v27 = vcombine.high %v1770_v54, %v1774_v55  ;;  %v4837_v33 = vcombine.low %v1770_v54, %v1774_v55  ;;  %v4839_v34 = vcombine.low %v1771_v56, %v1775_v57 }
 0x422   : > { %3402 = vmatpush1.bf16.msra.mxu0 %v4773_v28  ;;  %v4840_v28 = vcombine.high %v1771_v56, %v1775_v57  ;;  %v1834_v57 = vld [vmem:[%s6130_s15 + $0x510] sm:$0xff] }
 0x423   : > { %3484 = vmatpush1.bf16.msra.mxu1 %v4775_v29  ;;  %3403 = vmatprep.subr.bf16.mxu0 %v4782_v30  ;;  %v1778_v29 = vld [vmem:[%s6130_s15 + $0x350] sm:$0xff] }
 0x424   : > { %3485 = vmatprep.subr.bf16.mxu1 %v4784_v31  ;;  %v1782_v30 = vld [vmem:[%s6130_s15 + $0x370] sm:$0xff]  ;;  %v1779_v31 = vld [vmem:[%s6130_s15 + $0x358] sm:$0xff] }
 0x425   : > { %v4846_v35 = vcombine.high %v1778_v29, %v1782_v30  ;;  %v4845_v63 = vcombine.low %v1778_v29, %v1782_v30  ;;  %v4847_v1 = vcombine.low %v1779_v31, %v1783_v32 }
 0x426   : > { %3404 = vmatpush1.bf16.msra.mxu0 %v4781_v36  ;;  %v4848_v36 = vcombine.high %v1779_v31, %v1783_v32  ;;  %v1842_v32 = vld [vmem:[%s6130_s15 + $0x550] sm:$0xff] }
 0x427   : > { %3486 = vmatpush1.bf16.msra.mxu1 %v4783_v39  ;;  %3405 = vmatprep.subr.bf16.mxu0 %v4790_v14  ;;  %v1786_v39 = vld [vmem:[%s6130_s15 + $0x390] sm:$0xff] }
 0x428   : > { %3487 = vmatprep.subr.bf16.mxu1 %v4792_v60  ;;  %v1790_v14 = vld [vmem:[%s6130_s15 + $0x3b0] sm:$0xff]  ;;  %v1787_v60 = vld [vmem:[%s6130_s15 + $0x398] sm:$0xff] }
 0x429   : > { %v4854_v2 = vcombine.high %v1786_v39, %v1790_v14  ;;  %v4853_v10 = vcombine.low %v1786_v39, %v1790_v14  ;;  %v4855_v11 = vcombine.low %v1787_v60, %v1791_v61 }
 0x42a   : > { %3406 = vmatpush1.bf16.msra.mxu0 %v4789_v3  ;;  %v4856_v3 = vcombine.high %v1787_v60, %v1791_v61  ;;  %v1850_v61 = vld [vmem:[%s6130_s15 + $0x590] sm:$0xff] }
 0x42b   : > { %3488 = vmatpush1.bf16.msra.mxu1 %v4791_v6  ;;  %3407 = vmatprep.subr.bf16.mxu0 %v4798_v7  ;;  %v1794_v6 = vld [vmem:[%s6130_s15 + $0x3d0] sm:$0xff] }
 0x42c   : > { %3489 = vmatprep.subr.bf16.mxu1 %v4800_v8  ;;  %v1798_v7 = vld [vmem:[%s6130_s15 + $0x3f0] sm:$0xff]  ;;  %v1795_v8 = vld [vmem:[%s6130_s15 + $0x3d8] sm:$0xff] }
 0x42d   : > { %v4862_v13 = vcombine.high %v1794_v6, %v1798_v7  ;;  %v4861_v20 = vcombine.low %v1794_v6, %v1798_v7  ;;  %v4863_v21 = vcombine.low %v1795_v8, %v1799_v9 }
 0x42e   : > { %3408 = vmatpush1.bf16.msra.mxu0 %v4797_v15  ;;  %v4864_v15 = vcombine.high %v1795_v8, %v1799_v9  ;;  %v1858_v9 = vld [vmem:[%s6130_s15 + $0x5d0] sm:$0xff] }
 0x42f   : > { %3490 = vmatpush1.bf16.msra.mxu1 %v4799_v16  ;;  %3409 = vmatprep.subr.bf16.mxu0 %v4806_v17  ;;  %v1802_v16 = vld [vmem:[%s6130_s15 + $0x410] sm:$0xff] }
 0x430   : > { %3491 = vmatprep.subr.bf16.mxu1 %v4808_v18  ;;  %v1806_v17 = vld [vmem:[%s6130_s15 + $0x430] sm:$0xff]  ;;  %v1803_v18 = vld [vmem:[%s6130_s15 + $0x418] sm:$0xff] }
 0x431   : > { %v4870_v22 = vcombine.high %v1802_v16, %v1806_v17  ;;  %v4871_v40 = vcombine.low %v1803_v18, %v1807_v19 }
 0x432   : > { %3410 = vmatpush1.bf16.msra.mxu0 %v4805_v23  ;;  %v4872_v23 = vcombine.high %v1803_v18, %v1807_v19  ;;  %v1866_v19 = vld [vmem:[%s6130_s15 + $0x610] sm:$0xff] }
 0x433   : > { %3492 = vmatpush1.bf16.msra.mxu1 %v4807_v24  ;;  %3411 = vmatprep.subr.bf16.mxu0 %v4814_v25  ;;  %v1810_v24 = vld [vmem:[%s6130_s15 + $0x450] sm:$0xff] }
 0x434   : > { %3493 = vmatprep.subr.bf16.mxu1 %v4816_v26  ;;  %v1814_v25 = vld [vmem:[%s6130_s15 + $0x470] sm:$0xff]  ;;  %v4869_v26 = vcombine.low %v1802_v16, %v1806_v17 }
 0x435   : > { %v4878_v42 = vcombine.high %v1810_v24, %v1814_v25  ;;  %v4877_v5 = vcombine.low %v1810_v24, %v1814_v25 }
 0x436   : > { %3412 = vmatpush1.bf16.msra.mxu0 %v4813_v43  ;;  %v1818_v43 = vld [vmem:[%s6130_s15 + $0x490] sm:$0xff] }
 0x437   : > { %3494 = vmatpush1.bf16.msra.mxu1 %v4815_v44  ;;  %3413 = vmatprep.subr.bf16.mxu0 %v4822_v45  ;;  %v1822_v44 = vld [vmem:[%s6130_s15 + $0x4b0] sm:$0xff]  ;;  %v4880_v45 = vcombine.high %v1811_v37, %v1815_v38 }
 0x438   : > { %3495 = vmatprep.subr.bf16.mxu1 %v4824_v46  ;;  %v1819_v46 = vld [vmem:[%s6130_s15 + $0x498] sm:$0xff]  ;;  %v4886_v49 = vcombine.high %v1818_v43, %v1822_v44  ;;  %v4885_v54 = vcombine.low %v1818_v43, %v1822_v44  ;;  %v1874_v37 = vld [vmem:[%s6130_s15 + $0x650] sm:$0xff] }
 0x439   : > { %v4887_v55 = vcombine.low %v1819_v46, %v1823_v47  ;;  %v1878_v38 = vld [vmem:[%s6130_s15 + $0x670] sm:$0xff] }
 0x43a   : > { %3414 = vmatpush1.bf16.msra.mxu0 %v4821_v50  ;;  %v4888_v50 = vcombine.high %v1819_v46, %v1823_v47  ;;  %v1882_v47 = vld [vmem:[%s6130_s15 + $0x690] sm:$0xff] }
 0x43b   : > { %3496 = vmatpush1.bf16.msra.mxu1 %v4823_v51  ;;  %3415 = vmatprep.subr.bf16.mxu0 %v4830_v52  ;;  %v1826_v51 = vld [vmem:[%s6130_s15 + $0x4d0] sm:$0xff] }
 0x43c   : > { %3497 = vmatprep.subr.bf16.mxu1 %v4832_v53  ;;  %v1830_v52 = vld [vmem:[%s6130_s15 + $0x4f0] sm:$0xff]  ;;  %v1827_v53 = vld [vmem:[%s6130_s15 + $0x4d8] sm:$0xff] }
 0x43d   : > { %v4894_v56 = vcombine.high %v1826_v51, %v1830_v52 }
 0x43e   : > { %3416 = vmatpush1.bf16.msra.mxu0 %v4829_v41  ;;  %v1838_v41 = vld [vmem:[%s6130_s15 + $0x530] sm:$0xff] }
 0x43f   : > { %3498 = vmatpush1.bf16.msra.mxu1 %v4831_v59  ;;  %3417 = vmatprep.subr.bf16.mxu0 %v4838_v27  ;;  %v1835_v59 = vld [vmem:[%s6130_s15 + $0x518] sm:$0xff]  ;;  %v4902_v30 = vcombine.high %v1834_v57, %v1838_v41 }
 0x440   : > { %3499 = vmatprep.subr.bf16.mxu1 %v4840_v28  ;;  %v1839_v27 = vld [vmem:[%s6130_s15 + $0x538] sm:$0xff]  ;;  %v4893_v28 = vcombine.low %v1826_v51, %v1830_v52 }
 0x441   : > { %v4904_v31 = vcombine.high %v1835_v59, %v1839_v27  ;;  %v4903_v39 = vcombine.low %v1835_v59, %v1839_v27  ;;  %v1898_v27 = vld [vmem:[%s6130_s15 + $0x710] sm:$0xff] }
 0x442   : > { %3418 = vmatpush1.bf16.msra.mxu0 %v4837_v33  ;;  %v1846_v33 = vld [vmem:[%s6130_s15 + $0x570] sm:$0xff] }
 0x443   : > { %3500 = vmatpush1.bf16.msra.mxu1 %v4839_v34  ;;  %3419 = vmatprep.subr.bf16.mxu0 %v4846_v35  ;;  %v1843_v34 = vld [vmem:[%s6130_s15 + $0x558] sm:$0xff]  ;;  %v4910_v14 = vcombine.high %v1842_v32, %v1846_v33 }
 0x444   : > { %3501 = vmatprep.subr.bf16.mxu1 %v4848_v36  ;;  %v1847_v35 = vld [vmem:[%s6130_s15 + $0x578] sm:$0xff]  ;;  %v4901_v36 = vcombine.low %v1834_v57, %v1838_v41 }
 0x445   : > { %v4912_v60 = vcombine.high %v1843_v34, %v1847_v35  ;;  %v4911_v6 = vcombine.low %v1843_v34, %v1847_v35  ;;  %v1906_v35 = vld [vmem:[%s6130_s15 + $0x750] sm:$0xff] }
 0x446   : > { %3420 = vmatpush1.bf16.msra.mxu0 %v4845_v63  ;;  %v1854_v63 = vld [vmem:[%s6130_s15 + $0x5b0] sm:$0xff] }
 0x447   : > { %3502 = vmatpush1.bf16.msra.mxu1 %v4847_v1  ;;  %3421 = vmatprep.subr.bf16.mxu0 %v4854_v2  ;;  %v1851_v1 = vld [vmem:[%s6130_s15 + $0x598] sm:$0xff]  ;;  %v4918_v7 = vcombine.high %v1850_v61, %v1854_v63 }
 0x448   : > { %3503 = vmatprep.subr.bf16.mxu1 %v4856_v3  ;;  %v1855_v2 = vld [vmem:[%s6130_s15 + $0x5b8] sm:$0xff]  ;;  %v4909_v3 = vcombine.low %v1842_v32, %v1846_v33 }
 0x449   : > { %v4920_v8 = vcombine.high %v1851_v1, %v1855_v2  ;;  %v4919_v16 = vcombine.low %v1851_v1, %v1855_v2  ;;  %v1914_v2 = vld [vmem:[%s6130_s15 + $0x790] sm:$0xff] }
 0x44a   : > { %3422 = vmatpush1.bf16.msra.mxu0 %v4853_v10  ;;  %v1862_v10 = vld [vmem:[%s6130_s15 + $0x5f0] sm:$0xff] }
 0x44b   : > { %3504 = vmatpush1.bf16.msra.mxu1 %v4855_v11  ;;  %3423 = vmatprep.subr.bf16.mxu0 %v4862_v13  ;;  %v1859_v11 = vld [vmem:[%s6130_s15 + $0x5d8] sm:$0xff]  ;;  %v4926_v17 = vcombine.high %v1858_v9, %v1862_v10 }
 0x44c   : > { %3505 = vmatprep.subr.bf16.mxu1 %v4864_v15  ;;  %v1863_v13 = vld [vmem:[%s6130_s15 + $0x5f8] sm:$0xff]  ;;  %v4917_v15 = vcombine.low %v1850_v61, %v1854_v63 }
 0x44d   : > { %v4928_v18 = vcombine.high %v1859_v11, %v1863_v13  ;;  %v4927_v24 = vcombine.low %v1859_v11, %v1863_v13  ;;  %v1922_v13 = vld [vmem:[%s6130_s15 + $0x7d0] sm:$0xff] }
 0x44e   : > { %3424 = vmatpush1.bf16.msra.mxu0 %v4861_v20  ;;  %v1870_v20 = vld [vmem:[%s6130_s15 + $0x630] sm:$0xff] }
 0x44f   : > { %3506 = vmatpush1.bf16.msra.mxu1 %v4863_v21  ;;  %3434 = vmatprep.subr.bf16.mxu0 %v4870_v22  ;;  %v1867_v21 = vld [vmem:[%s6130_s15 + $0x618] sm:$0xff]  ;;  %v4934_v25 = vcombine.high %v1866_v19, %v1870_v20  ;;  %v4933_v43 = vcombine.low %v1866_v19, %v1870_v20 }
 0x450   : > { %3516 = vmatprep.subr.bf16.mxu1 %v4872_v23  ;;  %v1871_v22 = vld [vmem:[%s6130_s15 + $0x638] sm:$0xff]  ;;  %v4925_v23 = vcombine.low %v1858_v9, %v1862_v10 }
 0x451   : > { %3426 = vmatmul.mubr.bf16.vlgmr.msra.gmra.mrb[20].mxu0 %v6683_v62  ;;  %v4935_v44 = vcombine.low %v1867_v21, %v1871_v22 }
 0x452   : > { %3508 = vmatmul.mubr.bf16.vlgmr.msra.gmra.mrb[20].mxu1 %v6683_v62  ;;  %3435 = vmatpush1.bf16.msra.mxu0 %v4869_v26  ;;  %v1831_v62 = vld [vmem:[%s6130_s15 + $0x4f8] sm:$0xff]  ;;  %v4936_v26 = vcombine.high %v1867_v21, %v1871_v22 }
 0x453   : > { %3466 = vmatprep.mubr.bf16.mxu0 %v6706_v12  ;;  %3517 = vmatpush1.bf16.msra.mxu1 %v4871_v40  ;;  %v4895_v29 = vcombine.low %v1827_v53, %v1831_v62  ;;  %v1875_v40 = vld [vmem:[%s6130_s15 + $0x658] sm:$0xff] }
 0x454   : > { %3548 = vmatprep.mubr.bf16.mxu1 %v6706_v12  ;;  %3436 = vmatprep.subr.bf16.mxu0 %v4878_v42  ;;  %v4896_v12 = vcombine.high %v1827_v53, %v1831_v62  ;;  %v1879_v42 = vld [vmem:[%s6130_s15 + $0x678] sm:$0xff]  ;;  %v1890_v62 = vld [vmem:[%s6130_s15 + $0x6d0] sm:$0xff] }
 0x455   : > { %3518 = vmatprep.subr.bf16.mxu1 %v4880_v45  ;;  %v4942_v45 = vcombine.high %v1874_v37, %v1878_v38  ;;  %v4944_v46 = vcombine.high %v1875_v40, %v1879_v42  ;;  %v4943_v51 = vcombine.low %v1875_v40, %v1879_v42 }
 0x456   : > { %3437 = vmatpush1.bf16.msra.mxu0 %v4877_v5  ;;  %v1886_v5 = vld [vmem:[%s6130_s15 + $0x6b0] sm:$0xff] }
 0x457   : > { %3519 = vmatpush1.bf16.msra.mxu1 %v4879_v48  ;;  %3438 = vmatprep.subr.bf16.mxu0 %v4886_v49  ;;  %v1883_v48 = vld [vmem:[%s6130_s15 + $0x698] sm:$0xff]  ;;  %v4950_v52 = vcombine.high %v1882_v47, %v1886_v5 }
 0x458   : > { %3520 = vmatprep.subr.bf16.mxu1 %v4888_v50  ;;  %v1887_v49 = vld [vmem:[%s6130_s15 + $0x6b8] sm:$0xff]  ;;  %v4941_v50 = vcombine.low %v1874_v37, %v1878_v38 }
 0x459   : > { %v4952_v53 = vcombine.high %v1883_v48, %v1887_v49  ;;  %v4951_v57 = vcombine.low %v1883_v48, %v1887_v49 }
 0x45a   : > { %3439 = vmatpush1.bf16.msra.mxu0 %v4885_v54  ;;  %v1894_v54 = vld [vmem:[%s6130_s15 + $0x6f0] sm:$0xff] }
 0x45b   : > { %3521 = vmatpush1.bf16.msra.mxu1 %v4887_v55  ;;  %3440 = vmatprep.subr.bf16.mxu0 %v4894_v56  ;;  %v1891_v55 = vld [vmem:[%s6130_s15 + $0x6d8] sm:$0xff]  ;;  %v4958_v41 = vcombine.high %v1890_v62, %v1894_v54 }
 0x45c   : > { %3522 = vmatprep.subr.bf16.mxu1 %v4896_v12  ;;  %v1895_v56 = vld [vmem:[%s6130_s15 + $0x6f8] sm:$0xff]  ;;  %v4949_v12 = vcombine.low %v1882_v47, %v1886_v5  ;;  %v1670_v5 = vld [vmem:[#allocation2] sm:$0xff] }
 0x45d   : > { %v4960_v59 = vcombine.high %v1891_v55, %v1895_v56  ;;  %v4959_v32 = vcombine.low %v1891_v55, %v1895_v56 }
 0x45e   : > { %3441 = vmatpush1.bf16.msra.mxu0 %v4893_v28  ;;  %v1902_v28 = vld [vmem:[%s6130_s15 + $0x730] sm:$0xff] }
 0x45f   : > { %3523 = vmatpush1.bf16.msra.mxu1 %v4895_v29  ;;  %3442 = vmatprep.subr.bf16.mxu0 %v4902_v30  ;;  %v1899_v29 = vld [vmem:[%s6130_s15 + $0x718] sm:$0xff]  ;;  %v4966_v33 = vcombine.high %v1898_v27, %v1902_v28 }
 0x460   : > { %3524 = vmatprep.subr.bf16.mxu1 %v4904_v31  ;;  %v1903_v30 = vld [vmem:[%s6130_s15 + $0x738] sm:$0xff]  ;;  %v4957_v31 = vcombine.low %v1890_v62, %v1894_v54 }
 0x461   : > { %v4968_v34 = vcombine.high %v1899_v29, %v1903_v30  ;;  %v4967_v61 = vcombine.low %v1899_v29, %v1903_v30  ;;  %v5531_v29 = vld [vmem:[%s7135_s6 + $0x40] sm:$0xff] (!%p4993_p7)  }
 0x462   : > { %3443 = vmatpush1.bf16.msra.mxu0 %v4901_v36  ;;  %v1910_v36 = vld [vmem:[%s6130_s15 + $0x770] sm:$0xff]  ;;  %v5532_v30 = vld [vmem:[%s7135_s6 + $0xc0] sm:$0xff] (!%p4993_p7)  }
 0x463   : > { %3525 = vmatpush1.bf16.msra.mxu1 %v4903_v39  ;;  %3444 = vmatprep.subr.bf16.mxu0 %v4910_v14  ;;  %v1907_v39 = vld [vmem:[%s6130_s15 + $0x758] sm:$0xff]  ;;  %v4974_v63 = vcombine.high %v1906_v35, %v1910_v36 }
 0x464   : > { %3526 = vmatprep.subr.bf16.mxu1 %v4912_v60  ;;  %v1911_v14 = vld [vmem:[%s6130_s15 + $0x778] sm:$0xff]  ;;  %v4965_v60 = vcombine.low %v1898_v27, %v1902_v28 }
 0x465   : > { %v4976_v1 = vcombine.high %v1907_v39, %v1911_v14  ;;  %v4975_v9 = vcombine.low %v1907_v39, %v1911_v14  ;;  %v5539_v39 = vld [vmem:[%s7135_s6 + $0x50] sm:$0xff] (!%p4993_p7)  }
 0x466   : > { %3445 = vmatpush1.bf16.msra.mxu0 %v4909_v3  ;;  %v1918_v3 = vld [vmem:[%s6130_s15 + $0x7b0] sm:$0xff] }
 0x467   : > { %3527 = vmatpush1.bf16.msra.mxu1 %v4911_v6  ;;  %3446 = vmatprep.subr.bf16.mxu0 %v4918_v7  ;;  %v1915_v6 = vld [vmem:[%s6130_s15 + $0x798] sm:$0xff]  ;;  %v4982_v10 = vcombine.high %v1914_v2, %v1918_v3 }
 0x468   : > { %3528 = vmatprep.subr.bf16.mxu1 %v4920_v8  ;;  %v1919_v7 = vld [vmem:[%s6130_s15 + $0x7b8] sm:$0xff]  ;;  %v4973_v8 = vcombine.low %v1906_v35, %v1910_v36  ;;  %v5537_v35 = vld [vmem:[%s7135_s6 + $0x8] sm:$0xff] (!%p4993_p7)  }
 0x469   : > { %v4984_v11 = vcombine.high %v1915_v6, %v1919_v7  ;;  %v4983_v19 = vcombine.low %v1915_v6, %v1919_v7  ;;  %v5538_v36 = vld [vmem:[%s7135_s6 + $0x88] sm:$0xff] (!%p4993_p7)   ;;  %v5540_v14 = vld [vmem:[%s7135_s6 + $0xd0] sm:$0xff] (!%p4993_p7)   ;;  %v5547_v6 = vld [vmem:[%s7135_s6 + $0x60] sm:$0xff] (!%p4993_p7)  }
 0x46a   : > { %3447 = vmatpush1.bf16.msra.mxu0 %v4917_v15  ;;  %v1926_v15 = vld [vmem:[%s6130_s15 + $0x7f0] sm:$0xff]  ;;  %v5548_v7 = vld [vmem:[%s7135_s6 + $0xe0] sm:$0xff] (!%p4993_p7)  }
 0x46b   : > { %3529 = vmatpush1.bf16.msra.mxu1 %v4919_v16  ;;  %3448 = vmatprep.subr.bf16.mxu0 %v4926_v17  ;;  %v1923_v16 = vld [vmem:[%s6130_s15 + $0x7d8] sm:$0xff]  ;;  %v4990_v20 = vcombine.high %v1922_v13, %v1926_v15  ;;  %v4989_v22 = vcombine.low %v1922_v13, %v1926_v15  ;;  %v5553_v13 = vld [vmem:[%s7135_s6 + $0x28] sm:$0xff] (!%p4993_p7)  }
 0x46c   : > { %3530 = vmatprep.subr.bf16.mxu1 %v4928_v18  ;;  %v1927_v17 = vld [vmem:[%s6130_s15 + $0x7f8] sm:$0xff]  ;;  %v4981_v18 = vcombine.low %v1914_v2, %v1918_v3  ;;  %v5554_v15 = vld [vmem:[%s7135_s6 + $0xa8] sm:$0xff] (!%p4993_p7)  }
 0x46d   : > { %v4992_v21 = vcombine.high %v1923_v16, %v1927_v17  ;;  %v5545_v2 = vld [vmem:[%s7135_s6 + $0x18] sm:$0xff] (!%p4993_p7)  }
 0x46e   : > { %3449 = vmatpush1.bf16.msra.mxu0 %v4925_v23  ;;  %v4991_v23 = vcombine.low %v1923_v16, %v1927_v17  ;;  %v5546_v3 = vld [vmem:[%s7135_s6 + $0x98] sm:$0xff] (!%p4993_p7)   ;;  %v5555_v16 = vld [vmem:[%s7135_s6 + $0x70] sm:$0xff] (!%p4993_p7)  }
 0x46f   : > { %3531 = vmatpush1.bf16.msra.mxu1 %v4927_v24  ;;  %3450 = vmatprep.subr.bf16.mxu0 %v4934_v25  ;;  %v5556_v17 = vld [vmem:[%s7135_s6 + $0xf0] sm:$0xff] (!%p4993_p7)  }
 0x470   : > { %3532 = vmatprep.subr.bf16.mxu1 %v4936_v26 }
 0x472   : > { %3451 = vmatpush1.bf16.msra.mxu0 %v4933_v43 }
 0x473   : > { %3533 = vmatpush1.bf16.msra.mxu1 %v4935_v44  ;;  %3452 = vmatprep.subr.bf16.mxu0 %v4942_v45 }
 0x474   : > { %3534 = vmatprep.subr.bf16.mxu1 %v4944_v46 }
 0x476   : > { %3453 = vmatpush1.bf16.msra.mxu0 %v4941_v50 }
 0x477   : > { %3535 = vmatpush1.bf16.msra.mxu1 %v4943_v51  ;;  %3454 = vmatprep.subr.bf16.mxu0 %v4950_v52 }
 0x478   : > { %3536 = vmatprep.subr.bf16.mxu1 %v4952_v53 }
 0x47a   : > { %3455 = vmatpush1.bf16.msra.mxu0 %v4949_v12 }
 0x47b   : > { %3537 = vmatpush1.bf16.msra.mxu1 %v4951_v57  ;;  %3456 = vmatprep.subr.bf16.mxu0 %v4958_v41 }
 0x47c   : > { %3538 = vmatprep.subr.bf16.mxu1 %v4960_v59  ;;  %v1671_v59 = vld [vmem:[#allocation2 + $0x8] sm:$0xff] }
 0x47e   : > { %3457 = vmatpush1.bf16.msra.mxu0 %v4957_v31  ;;  %v5533_v31 = vld [vmem:[%s7135_s6] sm:$0xff] (!%p4993_p7)  }
 0x47f   : > { %3539 = vmatpush1.bf16.msra.mxu1 %v4959_v32  ;;  %3458 = vmatprep.subr.bf16.mxu0 %v4966_v33  ;;  %v5534_v32 = vld [vmem:[%s7135_s6 + $0x80] sm:$0xff] (!%p4993_p7)   ;;  %v5535_v33 = vld [vmem:[%s7135_s6 + $0x48] sm:$0xff] (!%p4993_p7)  }
 0x480   : > { %3540 = vmatprep.subr.bf16.mxu1 %v4968_v34  ;;  %v5536_v34 = vld [vmem:[%s7135_s6 + $0xc8] sm:$0xff] (!%p4993_p7)  }
 0x482   : > { %3459 = vmatpush1.bf16.msra.mxu0 %v4965_v60  ;;  %v5541_v60 = vld [vmem:[%s7135_s6 + $0x10] sm:$0xff] (!%p4993_p7)  }
 0x483   : > { %3541 = vmatpush1.bf16.msra.mxu1 %v4967_v61  ;;  %3460 = vmatprep.subr.bf16.mxu0 %v4974_v63  ;;  %v5542_v61 = vld [vmem:[%s7135_s6 + $0x90] sm:$0xff] (!%p4993_p7)   ;;  %v5543_v63 = vld [vmem:[%s7135_s6 + $0x58] sm:$0xff] (!%p4993_p7)  }
 0x484   : > { %3542 = vmatprep.subr.bf16.mxu1 %v4976_v1  ;;  %v5544_v1 = vld [vmem:[%s7135_s6 + $0xd8] sm:$0xff] (!%p4993_p7)  }
 0x486   : > { %3461 = vmatpush1.bf16.msra.mxu0 %v4973_v8  ;;  %v5549_v8 = vld [vmem:[%s7135_s6 + $0x20] sm:$0xff] (!%p4993_p7)  }
 0x487   : > { %3543 = vmatpush1.bf16.msra.mxu1 %v4975_v9  ;;  %3462 = vmatprep.subr.bf16.mxu0 %v4982_v10  ;;  %v5550_v9 = vld [vmem:[%s7135_s6 + $0xa0] sm:$0xff] (!%p4993_p7)   ;;  %v5551_v10 = vld [vmem:[%s7135_s6 + $0x68] sm:$0xff] (!%p4993_p7)  }
 0x488   : > { %3544 = vmatprep.subr.bf16.mxu1 %v4984_v11  ;;  %v5552_v11 = vld [vmem:[%s7135_s6 + $0xe8] sm:$0xff] (!%p4993_p7)  }
 0x48a   : > { %3463 = vmatpush1.bf16.msra.mxu0 %v4981_v18  ;;  %v5557_v18 = vld [vmem:[%s7135_s6 + $0x30] sm:$0xff] (!%p4993_p7)  }
 0x48b   : > { %3545 = vmatpush1.bf16.msra.mxu1 %v4983_v19  ;;  %3464 = vmatprep.subr.bf16.mxu0 %v4990_v20  ;;  %v3615_v19 = vsub.s32 (!%p4993_p7), 0, %v6677_v4  ;;  %v5558_v20 = vld [vmem:[%s7135_s6 + $0xb0] sm:$0xff] (!%p4993_p7)  }
 0x48c   : > { %3546 = vmatprep.subr.bf16.mxu1 %v4992_v21  ;;  %v3619_v21 = vsub.s32 (!%p4993_p7), 1, %v6677_v4 }
 0x48e   : > { %3465 = vmatpush1.bf16.msra.mxu0 %v4989_v22  ;;  %v5559_v22 = vld [vmem:[%s7135_s6 + $0x78] sm:$0xff] (!%p4993_p7)  }
 0x48f   : > { %3547 = vmatpush1.bf16.msra.mxu1 %v4991_v23  ;;  %5152 = vmatprep.subr.bf16.mxu0 (!%p4993_p7), %v5531_v29  ;;  %v3623_v23 = vsub.s32 (!%p4993_p7), 2, %v6677_v4 }
 0x490   : > { %5174 = vmatprep.subr.bf16.mxu1 (!%p4993_p7), %v5532_v30  ;;  %v5567_v30 = vld [vmem:[%s7135_s6 + $0x148] sm:$0xff] (!%p4993_p7)  }
 0x491   : > { %3467 = vmatmul.mubr.bf16.vlgmr.msra.gmra.mrb[20].mxu0 %v6687_v0 }
 0x492   : > { %3549 = vmatmul.mubr.bf16.vlgmr.msra.gmra.mrb[20].mxu1 %v6687_v0  ;;  %5153 = vmatpush3.bf16.msra.mxu0 (!%p4993_p7), %v5533_v31 }
 0x493   : > { %5175 = vmatpush3.bf16.msra.mxu1 (!%p4993_p7), %v5534_v32  ;;  %5154 = vmatprep.subr.bf16.mxu0 (!%p4993_p7), %v5535_v33  ;;  %v5566_v33 = vld [vmem:[%s7135_s6 + $0x180] sm:$0xff] (!%p4993_p7)  }
 0x494   : > { %5176 = vmatprep.subr.bf16.mxu1 (!%p4993_p7), %v5536_v34 }
 0x496   : > { %5155 = vmatpush3.bf16.msra.mxu0 (!%p4993_p7), %v5537_v35 }
 0x497   : > { %5177 = vmatpush3.bf16.msra.mxu1 (!%p4993_p7), %v5538_v36  ;;  %5156 = vmatprep.subr.bf16.mxu0 (!%p4993_p7), %v5539_v39  ;;  %v5568_v36 = vld [vmem:[%s7135_s6 + $0x1c8] sm:$0xff] (!%p4993_p7)  }
 0x498   : > { %5178 = vmatprep.subr.bf16.mxu1 (!%p4993_p7), %v5540_v14  ;;  %v5569_v39 = vld [vmem:[%s7135_s6 + $0x108] sm:$0xff] (!%p4993_p7)   ;;  %v5571_v14 = vld [vmem:[%s7135_s6 + $0x150] sm:$0xff] (!%p4993_p7)  }
 0x49a   : > { %5157 = vmatpush3.bf16.msra.mxu0 (!%p4993_p7), %v5541_v60  ;;  %v5570_v60 = vld [vmem:[%s7135_s6 + $0x188] sm:$0xff] (!%p4993_p7)  }
 0x49b   : > { %5179 = vmatpush3.bf16.msra.mxu1 (!%p4993_p7), %v5542_v61  ;;  %5158 = vmatprep.subr.bf16.mxu0 (!%p4993_p7), %v5543_v63 }
 0x49c   : > { %5180 = vmatprep.subr.bf16.mxu1 (!%p4993_p7), %v5544_v1  ;;  %v5572_v1 = vld [vmem:[%s7135_s6 + $0x1d0] sm:$0xff] (!%p4993_p7)  }
 0x49e   : > { %5159 = vmatpush3.bf16.msra.mxu0 (!%p4993_p7), %v5545_v2  ;;  %v5573_v2 = vld [vmem:[%s7135_s6 + $0x110] sm:$0xff] (!%p4993_p7)  }
 0x49f   : > { %5181 = vmatpush3.bf16.msra.mxu1 (!%p4993_p7), %v5546_v3  ;;  %5160 = vmatprep.subr.bf16.mxu0 (!%p4993_p7), %v5547_v6  ;;  %v5575_v3 = vld [vmem:[%s7135_s6 + $0x158] sm:$0xff] (!%p4993_p7)   ;;  %v5574_v6 = vld [vmem:[%s7135_s6 + $0x190] sm:$0xff] (!%p4993_p7)  }
 0x4a0   : > { %5182 = vmatprep.subr.bf16.mxu1 (!%p4993_p7), %v5548_v7 }
 0x4a2   : > { %5161 = vmatpush3.bf16.msra.mxu0 (!%p4993_p7), %v5549_v8 }
 0x4a3   : > { %5183 = vmatpush3.bf16.msra.mxu1 (!%p4993_p7), %v5550_v9  ;;  %5162 = vmatprep.subr.bf16.mxu0 (!%p4993_p7), %v5551_v10  ;;  %v5576_v9 = vld [vmem:[%s7135_s6 + $0x1d8] sm:$0xff] (!%p4993_p7)  }
 0x4a4   : > { %5184 = vmatprep.subr.bf16.mxu1 (!%p4993_p7), %v5552_v11  ;;  %v5577_v10 = vld [vmem:[%s7135_s6 + $0x118] sm:$0xff] (!%p4993_p7)   ;;  %v5579_v11 = vld [vmem:[%s7135_s6 + $0x160] sm:$0xff] (!%p4993_p7)  }
 0x4a6   : > { %5163 = vmatpush3.bf16.msra.mxu0 (!%p4993_p7), %v5553_v13  ;;  %v5578_v13 = vld [vmem:[%s7135_s6 + $0x198] sm:$0xff] (!%p4993_p7)  }
 0x4a7   : > { %5185 = vmatpush3.bf16.msra.mxu1 (!%p4993_p7), %v5554_v15  ;;  %5164 = vmatprep.subr.bf16.mxu0 (!%p4993_p7), %v5555_v16  ;;  %v5580_v16 = vld [vmem:[%s7135_s6 + $0x1e0] sm:$0xff] (!%p4993_p7)  }
 0x4a8   : > { %5186 = vmatprep.subr.bf16.mxu1 (!%p4993_p7), %v5556_v17  ;;  %v5581_v17 = vld [vmem:[%s7135_s6 + $0x120] sm:$0xff] (!%p4993_p7)  }
 0x4aa   : > { %5165 = vmatpush3.bf16.msra.mxu0 (!%p4993_p7), %v5557_v18  ;;  %v5583_v18 = vld [vmem:[%s7135_s6 + $0x168] sm:$0xff] (!%p4993_p7)  }
 0x4ab   : > { %5187 = vmatpush3.bf16.msra.mxu1 (!%p4993_p7), %v5558_v20  ;;  %5166 = vmatprep.subr.bf16.mxu0 (!%p4993_p7), %v5559_v22  ;;  %v5582_v20 = vld [vmem:[%s7135_s6 + $0x1a0] sm:$0xff] (!%p4993_p7)   ;;  %v5584_v22 = vld [vmem:[%s7135_s6 + $0x1e8] sm:$0xff] (!%p4993_p7)  }
 0x4e4   : > { %v3304_v24 = vpop.f32.mrb[16].mxu0  ;;  %v3386_v25 = vpop.f32.mrb[16].mxu1 }
 0x4e5   : > { %v3306_v26 = vpop.f32.mrb[17].mxu0  ;;  %v3388_v37 = vpop.f32.mrb[17].mxu1 }
 0x4e6   : > { %v3565_v38 = vcombine.low %v3304_v24, %v3306_v26  ;;  %v3566_v40 = vcombine.low %v3386_v25, %v3388_v37  ;;  %v3308_v42 = vpop.f32.mrb[18].mxu0  ;;  %v3390_v43 = vpop.f32.mrb[18].mxu1  ;;  %v5560_v24 = vld [vmem:[%s7135_s6 + $0xf8] sm:$0xff] (!%p4993_p7)   ;;  %v3627_v25 = vsub.s32 (!%p4993_p7), 3, %v6677_v4 }
 0x4e7   : > { %v3309_v44 = vpop.f32.mrb[19].mxu0  ;;  %v3391_v45 = vpop.f32.mrb[19].mxu1  ;;  %v5561_v26 = vld [vmem:[%s7135_s6 + $0x38] sm:$0xff] (!%p4993_p7)   ;;  %5188 = vmatprep.subr.bf16.mxu1 (!%p4993_p7), %v5560_v24 }
 0x4e8   : > { %v3573_v46 = vrot.slane %v3565_v38, %v6680_v58  ;;  %v3580_v47 = vrot.slane %v3566_v40, %v6680_v58  ;;  %v5562_v37 = vld [vmem:[%s7135_s6 + $0xb8] sm:$0xff] (!%p4993_p7)   ;;  %5167 = vmatpush3.bf16.msra.mxu0 (!%p4993_p7), %v5561_v26  ;;  %v5563_v45 = vld [vmem:[%s7135_s6 + $0x140] sm:$0xff] (!%p4993_p7)   ;;  %v5587_v26 = vld [vmem:[%s7135_s6 + $0x170] sm:$0xff] (!%p4993_p7)  }
 0x4e9   : > { %v3611_v38 = vld [vmem:[#allocation10] sm:$0xff] (!%p4993_p7)  ;;  %5189 = vmatpush3.bf16.msra.mxu1 (!%p4993_p7), %v5562_v37  ;;  %5196 = vmatprep.subr.bf16.mxu0 (!%p4993_p7), %v5563_v45  ;;  %v5586_v37 = vld [vmem:[%s7135_s6 + $0x1a8] sm:$0xff] (!%p4993_p7)  }
 0x4ea   : > { %v3581_v48 = vcombine.low %v3573_v46, %v3580_v47  ;;  %v3616_v40 = vrot.slane (!%p4993_p7), %v3611_v38, %v3615_v19  ;;  %v3620_v42 = vrot.slane (!%p4993_p7), %v3611_v38, %v3619_v21  ;;  %v3624_v43 = vrot.slane (!%p4993_p7), %v3611_v38, %v3623_v23  ;;  %v5564_v46 = vld [vmem:[%s7135_s6 + $0x1c0] sm:$0xff] (!%p4993_p7)   ;;  %v5585_v23 = vld [vmem:[%s7135_s6 + $0x128] sm:$0xff] (!%p4993_p7)  }
 0x4eb   : > { %v3628_v44 = vrot.slane (!%p4993_p7), %v3611_v38, %v3627_v25  ;;  %5218 = vmatprep.subr.bf16.mxu1 (!%p4993_p7), %v5564_v46  ;;  %v5591_v46 = vld [vmem:[%s7135_s6 + $0x178] sm:$0xff] (!%p4993_p7)  }
 0x4ec   : > { %v3601_v49 = vadd.f32 %v3581_v48, %v1670_v5  ;;  %v3645_v47 = vcombine.low (!%p4993_p7), %v3616_v40, %v3620_v42  ;;  %v5588_v42 = vld [vmem:[%s7135_s6 + $0x1f0] sm:$0xff] (!%p4993_p7)  }
 0x4ed   : > { %v3646_v5 = vcombine.low (!%p4993_p7), %v3624_v43, %v3628_v44  ;;  %v5589_v43 = vld [vmem:[%s7135_s6 + $0x130] sm:$0xff] (!%p4993_p7)  }
 0x4ee   : > { %3603 = vst [vmem:[#allocation2] sm:$0xff] %v3601_v49  ;;  %v3653_v48 = vrot.slane (!%p4993_p7), %v3645_v47, %v6680_v58 }
 0x4ef   : > { %v3660_v49 = vrot.slane (!%p4993_p7), %v3646_v5, %v6680_v58  ;;  %v5592_v5 = vld [vmem:[%s7135_s6 + $0x1f8] sm:$0xff] (!%p4993_p7)  }
 0x564   : > { %v3468_v50 = vpop.f32.mrb[20].mxu0 }
 0x565   : > { %v3550_v0 = vpop.f32.mrb[20].mxu1  ;;  %v3470_v51 = vpop.f32.mrb[21].mxu0 }
 0x566   : > { %v3582_v52 = vcombine.low %v3468_v50, %v3470_v51  ;;  %v3552_v53 = vpop.f32.mrb[21].mxu1  ;;  %v3472_v62 = vpop.f32.mrb[22].mxu0  ;;  %v3609_v50 = vld [vmem:[#allocation2] sm:$0xff] (!%p4993_p7) }
 0x567   : > { %v3583_v54 = vcombine.low %v3550_v0, %v3552_v53  ;;  %v3554_v55 = vpop.f32.mrb[22].mxu1  ;;  %v3473_v56 = vpop.f32.mrb[23].mxu0  ;;  %v3661_v0 = vcombine.low (!%p4993_p7), %v3653_v48, %v3660_v49  ;;  %v3631_v62 = vsub.s32 (!%p4993_p7), 4, %v6677_v4  ;;  %v5593_v48 = vld [vmem:[%s7135_s6 + $0x138] sm:$0xff] (!%p4993_p7)  }
 0x568   : > { %v3590_v12 = vrot.slane %v3582_v52, %v6680_v58  ;;  %v3555_v57 = vpop.f32.mrb[23].mxu1  ;;  %v5594_v49 = vld [vmem:[%s7135_s6 + $0x1b8] sm:$0xff] (!%p4993_p7)  }
 0x569   : > { %v3597_v41 = vrot.slane %v3583_v54, %v6680_v58  ;;  %3608 = sbr.rel (%p4993_p7) target bundleno = 1646 (0x66e), region = 84  ;;  %v3681_v51 = vadd.f32 (!%p4993_p7), %v3661_v0, %v3609_v50  ;;  %v3635_v54 = vsub.s32 (!%p4993_p7), 5, %v6677_v4  ;;  %v3643_v57 = vsub.s32 (!%p4993_p7), 7, %v6677_v4 }
 0x56a   : > { %v3632_v31 = vrot.slane (!%p4993_p7), %v3611_v38, %v3631_v62 }
 0x56b   : > { %v3598_v27 = vcombine.low %v3590_v12, %v3597_v41  ;;  %v3692_v52 = vrot.slane (!%p4993_p7), %v3681_v51, %v6680_v58  ;;  %v3685_v53 = vcombine.high (!%p4993_p7), %v3681_v51, %v3681_v51  ;;  %v3639_v12 = vsub.s32 (!%p4993_p7), 6, %v6677_v4 }
 0x56c   : > { %v3636_v4 = vrot.slane (!%p4993_p7), %v3611_v38, %v3635_v54  ;;  %v3644_v35 = vrot.slane (!%p4993_p7), %v3611_v38, %v3643_v57 }
 0x56d   : > { %v3602_v28 = vadd.f32 %v3598_v27, %v1671_v59  ;;  %v3700_v55 = vcombine.high (!%p4993_p7), %v3692_v52, %v3692_v52  ;;  %v3699_v56 = vrot.slane (!%p4993_p7), %v3685_v53, %v6680_v58  ;;  %v3727_v41 = vpack.c.bf16 (!%p4993_p7), %v3692_v52, %v3692_v52  ;;  %v4994_v52 = vld [vmem:[#allocation11] ss:$0 sm:$0xff] (!%p4993_p7) }
 0x56e   : > { %v3640_v34 = vrot.slane (!%p4993_p7), %v3611_v38, %v3639_v12  ;;  %v3662_v61 = vcombine.low (!%p4993_p7), %v3632_v31, %v3636_v4 }
 0x56f   : > { %3604 = vst [vmem:[#allocation2 + $0x8] sm:$0xff] %v3602_v28  ;;  %v3728_v59 = vpack.c.bf16 (!%p4993_p7), %v3700_v55, %v3700_v55  ;;  %v3701_v27 = vcombine.high (!%p4993_p7), %v3699_v56, %v3699_v56  ;;  %v5565_v28 = vld [vmem:[%s7135_s6 + $0x100] sm:$0xff] (!%p4993_p7)   ;;  %v3729_v29 = vpack.c.bf16 (!%p4993_p7), %v3699_v56, %v3699_v56 }
 0x570   : > { %v3663_v63 = vcombine.low %v3640_v34, %v3644_v35  ;;  %v3670_v7 = vrot.slane %v3662_v61, %v6680_v58 }
 0x571   : > { %4286 = vmatprep.mubr.bf16.mxu0 %v3728_v59  ;;  %v3730_v32 = vpack.c.bf16 %v3701_v27, %v3701_v27 }
 0x572   : > { %4287 = vmatmul.mubr.bf16.vlgmr.msra.gmra.mrb[0].mxu0 %v3727_v41  ;;  %v3677_v8 = vrot.slane %v3663_v63, %v6680_v58 }
 0x573   : > { %4326 = vmatprep.mubr.bf16.mxu1 %v3730_v32  ;;  %5197 = vmatpush3.bf16.msra.mxu0 %v5565_v28 }
 0x574   : > { %4327 = vmatmul.mubr.bf16.vlgmr.msra.gmra.mrb[0].mxu1 %v3729_v29  ;;  %5198 = vmatprep.subr.bf16.mxu0 %v5567_v30  ;;  %v3678_v15 = vcombine.low %v3670_v7, %v3677_v8 }
 0x575   : > { %5219 = vmatpush3.bf16.msra.mxu1 %v5566_v33 }
 0x576   : > { %5220 = vmatprep.subr.bf16.mxu1 %v5568_v36  ;;  %v3610_v19 = vld [vmem:[#allocation2 + $0x8] sm:$0xff] }
 0x577   : > { %5199 = vmatpush3.bf16.msra.mxu0 %v5569_v39  ;;  %v3682_v21 = vadd.f32 %v3678_v15, %v3610_v19 }
 0x578   : > { %5200 = vmatprep.subr.bf16.mxu0 %v5571_v14 }
 0x579   : > { %5221 = vmatpush3.bf16.msra.mxu1 %v5570_v60  ;;  %v3709_v24 = vrot.slane %v3682_v21, %v6680_v58  ;;  %v3702_v25 = vcombine.high %v3682_v21, %v3682_v21 }
 0x57a   : > { %5222 = vmatprep.subr.bf16.mxu1 %v5572_v1 }
 0x57b   : > { %5201 = vmatpush3.bf16.msra.mxu0 %v5573_v2  ;;  %v3717_v38 = vcombine.high %v3709_v24, %v3709_v24  ;;  %v3716_v40 = vrot.slane %v3702_v25, %v6680_v58  ;;  %v5590_v58 = vld [vmem:[%s7135_s6 + $0x1b0] sm:$0xff]   ;;  %v3731_v50 = vpack.c.bf16 %v3709_v24, %v3709_v24 }
 0x57c   : > { %5202 = vmatprep.subr.bf16.mxu0 %v5575_v3 }
 0x57d   : > { %5223 = vmatpush3.bf16.msra.mxu1 %v5574_v6  ;;  %v3732_v44 = vpack.c.bf16 %v3717_v38, %v3717_v38  ;;  %v3718_v45 = vcombine.high %v3716_v40, %v3716_v40  ;;  %v3733_v0 = vpack.c.bf16 %v3716_v40, %v3716_v40 }
 0x57e   : > { %5224 = vmatprep.subr.bf16.mxu1 %v5576_v9 }
 0x57f   : > { %5203 = vmatpush3.bf16.msra.mxu0 %v5577_v10  ;;  %4366 = vmatprep.mubr.bf16.mxu0 %v3732_v44  ;;  %v3734_v47 = vpack.c.bf16 %v3718_v45, %v3718_v45 }
 0x580   : > { %5204 = vmatprep.subr.bf16.mxu0 %v5579_v11 }
 0x581   : > { %5225 = vmatpush3.bf16.msra.mxu1 %v5578_v13  ;;  %4406 = vmatprep.mubr.bf16.mxu1 %v3734_v47 }
 0x582   : > { %5226 = vmatprep.subr.bf16.mxu1 %v5580_v16 }
 0x583   : > { %5205 = vmatpush3.bf16.msra.mxu0 %v5581_v17 }
 0x584   : > { %5206 = vmatprep.subr.bf16.mxu0 %v5583_v18 }
 0x585   : > { %5227 = vmatpush3.bf16.msra.mxu1 %v5582_v20 }
 0x586   : > { %5228 = vmatprep.subr.bf16.mxu1 %v5584_v22 }
 0x587   : > { %5207 = vmatpush3.bf16.msra.mxu0 %v5585_v23 }
 0x588   : > { %5208 = vmatprep.subr.bf16.mxu0 %v5587_v26 }
 0x589   : > { %5229 = vmatpush3.bf16.msra.mxu1 %v5586_v37 }
 0x58a   : > { %5230 = vmatprep.subr.bf16.mxu1 %v5588_v42 }
 0x58b   : > { %5209 = vmatpush3.bf16.msra.mxu0 %v5589_v43 }
 0x58c   : > { %5210 = vmatprep.subr.bf16.mxu0 %v5591_v46 }
 0x58d   : > { %5231 = vmatpush3.bf16.msra.mxu1 %v5590_v58 }
 0x58e   : > { %5232 = vmatprep.subr.bf16.mxu1 %v5592_v5 }
 0x58f   : > { %5211 = vmatpush3.bf16.msra.mxu0 %v5593_v48 }
 0x591   : > { %5233 = vmatpush3.bf16.msra.mxu1 %v5594_v49 }
 0x592   : > { %4367 = vmatmul.mubr.bf16.vlgmr.msra.gmra.mrb[4].mxu0 %v3731_v50 }
 0x594   : > { %4407 = vmatmul.mubr.bf16.vlgmr.msra.gmra.mrb[4].mxu1 %v3733_v0 }
 0x645   : > { %v5168_v51 = vpop.f32.mrb[0].mxu0 }
 0x646   : > { %v5169_v53 = vpop.f32.mrb[1].mxu0 }
 0x647   : > { %v5190_v62 = vpop.f32.mrb[0].mxu1  ;;  %v5170_v54 = vadd.f32 %v5169_v53, %v5168_v51  ;;  %v5171_v55 = vpop.f32.mrb[2].mxu0 }
 0x648   : > { %v5191_v56 = vpop.f32.mrb[1].mxu1  ;;  %v5172_v12 = vpop.f32.mrb[3].mxu0 }
 0x649   : > { %v4289_v57 = vadd.f32 %v5170_v54, %v4994_v52  ;;  %v5192_v41 = vadd.f32 %v5191_v56, %v5190_v62  ;;  %v5193_v59 = vpop.f32.mrb[2].mxu1 }
 0x64a   : > { %v5194_v27 = vpop.f32.mrb[3].mxu1 }
 0x64b   : > { %v4329_v28 = vadd.f32 %v5192_v41, %v4289_v57 }
 0x665   : > { %v5212_v29 = vpop.f32.mrb[4].mxu0 }
 0x666   : > { %v5213_v30 = vpop.f32.mrb[5].mxu0 }
 0x667   : > { %v5234_v31 = vpop.f32.mrb[4].mxu1  ;;  %v5214_v32 = vadd.f32 %v5213_v30, %v5212_v29  ;;  %v5215_v33 = vpop.f32.mrb[6].mxu0 }
 0x668   : > { %v5235_v4 = vpop.f32.mrb[5].mxu1  ;;  %v5216_v34 = vpop.f32.mrb[7].mxu0 }
 0x669   : > { %v4369_v35 = vadd.f32 %v5214_v32, %v4329_v28  ;;  %v5236_v36 = vadd.f32 %v5235_v4, %v5234_v31  ;;  %v5237_v39 = vpop.f32.mrb[6].mxu1 }
 0x66a   : > { %v5238_v14 = vpop.f32.mrb[7].mxu1 }
 0x66b   : > { %v4409_v60 = vadd.f32 %v5236_v36, %v4369_v35 }
 0x66d   : > { %4415 = vst.msk [vmem:[%s7137_s8] sm:$0x3] %vm4414_vm2, %v4409_v60 }
 0x66e PF: > { %p23_p11 = scmp.ge.s32.totalorder %s6016_s23, 6   ;;  %s7156_s27 = smov %s5809_s28 }
 0x66f   : > { %s7157_s28 = smov %s5813_s29  ;;  %s7158_s29 = smov %s6028_s9 }
 0x670   : > { %s7159_s30 = smov %s6016_s23  ;;  %25 = sbr.rel (!%p23_p11) target bundleno = 9 (0x9), region = 126 }
 0x677   :  { %4427 = vsyncpa [#allocation4], 1 }
 0x678   :  { %4429 = vsyncpa [#allocation4 + $0x1], 1 }
 0x679   :  { %4430 = vsyncpa [#allocation6], 1 }
 0x67a   :  { %4431 = vsyncpa [#allocation9], 1 }
 0x67b   :  { %4433 = vsyncpa [#allocation9 + $0x1], 1 }
 0x67c   :  { %4434 = vsyncpa [#allocation12], 1 }

</bundles_post_ra>
